<compile_context>
chip_gen: v5e
topology: v5e:2x2
jax: 0.10.0
libtpu: 0.0.40
codegen_flags: <defaults>
</compile_context>

<pallas_src>
import functools
import math

import jax
import jax.numpy as jnp
from jax import lax
from jax.experimental import pallas as pl
from jax.experimental.pallas import tpu as pltpu

_LN_EPS = 1e-5                         # torch.nn.LayerNorm default eps
_MXU_DTYPE = jnp.bfloat16              # bf16-native MXU on v5e/v6e/v7x


# ---------------------------------------------------------------------------
# Per-generation VMEM budget
# ---------------------------------------------------------------------------
def _vmem_limit_bytes():
    kind = ""
    try:
        kind = jax.devices()[0].device_kind.lower()
    except Exception:
        pass
    if "v5" in kind or "v6" in kind:
        return 100 * 1024 * 1024        # 128 MiB physical VMEM -> use most of it
    return 48 * 1024 * 1024             # v7x (64 MiB physical) / unknown: conservative


def _compiler_params():
    return pltpu.CompilerParams(
        dimension_semantics=("parallel",),
        vmem_limit_bytes=_vmem_limit_bytes(),
    )


# ---------------------------------------------------------------------------
# Probe: can constant-index weight blocks be single-buffered (pl.Buffered(1))?
# ---------------------------------------------------------------------------
def _probe_buffered():
    try:
        pm = pl.Buffered(1)

        def _probe_kernel(w_ref, o_ref):
            o_ref[...] = w_ref[...] + 1.0

        out = pl.pallas_call(
            _probe_kernel,
            out_shape=jax.ShapeDtypeStruct((8, 128), jnp.float32),
            grid=(2,),
            in_specs=[pl.BlockSpec((8, 128), lambda i: (0, 0), pipeline_mode=pm)],
            out_specs=pl.BlockSpec((8, 128), lambda i: (0, 0)),
        )(jnp.zeros((8, 128), jnp.float32))
        out = jax.block_until_ready(out)
        return pm if bool(jnp.all(out == 1.0)) else None
    except Exception:
        return None


_WEIGHT_PIPELINE_MODE = _probe_buffered()


def _const_spec(shape):
    """BlockSpec for an operand whose block never changes across the 1-D grid."""
    index_map = lambda i: tuple(0 for _ in shape)
    if _WEIGHT_PIPELINE_MODE is not None:
        return pl.BlockSpec(shape, index_map, pipeline_mode=_WEIGHT_PIPELINE_MODE)
    return pl.BlockSpec(shape, index_map)


# ---------------------------------------------------------------------------
# Fused TransformerLayer kernel (one batch element per grid step)
# ---------------------------------------------------------------------------
def layer_kernel(x_ref,
                 ln1_g_ref, ln1_b_ref,
                 wq_ref, bq_ref, wk_ref, bk_ref, wv_ref, bv_ref,
                 wo_ref, bo_ref, ls_ref,
                 ln2_g_ref, ln2_b_ref,
                 w1_ref, b1_ref, w2_ref, b2_ref,
                 o_ref,
                 ctx_ref,
                 *, num_heads):
    x = x_ref[...]                                            # (S, D) f32
    S, D = x.shape
    dk = D // num_heads
    inv_sqrt_dk = 1.0 / math.sqrt(dk)

    # ---- attention sublayer: LayerNorm -> Q/K/V -> per-head softmax attn ----
    mu = jnp.mean(x, axis=-1, keepdims=True)
    var = jnp.mean(jnp.square(x - mu), axis=-1, keepdims=True)
    h = (x - mu) * lax.rsqrt(var + _LN_EPS) * ln1_g_ref[...] + ln1_b_ref[...]

    hb = h.astype(_MXU_DTYPE)
    # cast q/k/v to bf16 ONCE right after the bias add (MXU operands are bf16
    # anyway; this keeps only one copy of each activation live).
    q = (jnp.dot(hb, wq_ref[...], preferred_element_type=jnp.float32)
         + bq_ref[...]).astype(_MXU_DTYPE)
    k = (jnp.dot(hb, wk_ref[...], preferred_element_type=jnp.float32)
         + bk_ref[...]).astype(_MXU_DTYPE)
    v = (jnp.dot(hb, wv_ref[...], preferred_element_type=jnp.float32)
         + bv_ref[...]).astype(_MXU_DTYPE)

    for head in range(num_heads):                             # static unroll (small H)
        sl = slice(head * dk, (head + 1) * dk)
        qh, kh, vh = q[:, sl], k[:, sl], v[:, sl]             # bf16 (S, dk)
        # scores = q @ k^T / sqrt(dk)  (contract on feature dim, no transpose op)
        s = lax.dot_general(qh, kh, (((1,), (1,)), ((), ())),
                            preferred_element_type=jnp.float32) * inv_sqrt_dk
        s = s - jnp.max(s, axis=-1, keepdims=True)
        p = jnp.exp(s)
        p = p * pl.reciprocal(jnp.sum(p, axis=-1, keepdims=True), approx=False)
        ctx = jnp.dot(p.astype(_MXU_DTYPE), vh, preferred_element_type=jnp.float32)
        # park this head's context in the bf16 VMEM scratch at its column slice
        ctx_ref[:, sl] = ctx.astype(_MXU_DTYPE)

    # one fat output projection with contraction K = D (instead of H narrow K=dk)
    attn = jnp.dot(ctx_ref[...], wo_ref[...],
                   preferred_element_type=jnp.float32) + bo_ref[...]
    x1 = x + attn * ls_ref[...]        # LayerScale; dropout = identity (eval)

    # ---- FFN sublayer: norm2 -> linear1 -> ReLU -> linear2 -> residual ----
    mu2 = jnp.mean(x1, axis=-1, keepdims=True)
    var2 = jnp.mean(jnp.square(x1 - mu2), axis=-1, keepdims=True)
    h2 = (x1 - mu2) * lax.rsqrt(var2 + _LN_EPS) * ln2_g_ref[...] + ln2_b_ref[...]
    a = jnp.dot(h2.astype(_MXU_DTYPE), w1_ref[...],
                preferred_element_type=jnp.float32) + b1_ref[...]
    a = jnp.maximum(a, 0.0)                                   # ReLU; dropout = identity
    y = jnp.dot(a.astype(_MXU_DTYPE), w2_ref[...],
                preferred_element_type=jnp.float32) + b2_ref[...]
    o_ref[...] = (x1 + y).astype(o_ref.dtype)                 # residual add fused


def transformer_layer(x, p, *, num_heads):
    B, S, D = x.shape
    ff = p["w1"].shape[1]
    row = lambda a: a.reshape(1, -1)
    wq = p["wq"].astype(_MXU_DTYPE)
    wk = p["wk"].astype(_MXU_DTYPE)
    wv = p["wv"].astype(_MXU_DTYPE)
    wo = p["wo"].astype(_MXU_DTYPE)
    w1 = p["w1"].astype(_MXU_DTYPE)
    w2 = p["w2"].astype(_MXU_DTYPE)

    cost = pl.CostEstimate(
        flops=B * (8 * S * D * D + 4 * S * S * D + 4 * S * D * ff),
        transcendentals=B * (num_heads * S * S + 4 * S),
        bytes_accessed=(2 * B * S * D * 4
                        + (4 * D * D + 2 * D * ff) * 2
                        + (9 * D + ff) * 4),
    )

    return pl.pallas_call(
        functools.partial(layer_kernel, num_heads=num_heads),
        out_shape=jax.ShapeDtypeStruct((B, S, D), x.dtype),
        grid_spec=pltpu.PrefetchScalarGridSpec(
            num_scalar_prefetch=0,
            grid=(B,),
            in_specs=[
                pl.BlockSpec((None, S, D), lambda b: (b, 0, 0)),   # x (per batch)
                _const_spec((1, D)),    # MHA LayerNorm gamma
                _const_spec((1, D)),    # MHA LayerNorm beta
                _const_spec((D, D)),    # Wq (bf16)
                _const_spec((1, D)),    # bq
                _const_spec((D, D)),    # Wk (bf16)
                _const_spec((1, D)),    # bk
                _const_spec((D, D)),    # Wv (bf16)
                _const_spec((1, D)),    # bv
                _const_spec((D, D)),    # Wo (bf16)
                _const_spec((1, D)),    # bo
                _const_spec((1, D)),    # layer_scale
                _const_spec((1, D)),    # norm2 gamma
                _const_spec((1, D)),    # norm2 beta
                _const_spec((D, ff)),   # W1 (bf16)
                _const_spec((1, ff)),   # b1
                _const_spec((ff, D)),   # W2 (bf16)
                _const_spec((1, D)),    # b2
            ],
            out_specs=pl.BlockSpec((None, S, D), lambda b: (b, 0, 0)),
            scratch_shapes=[pltpu.VMEM((S, D), _MXU_DTYPE)],    # per-head ctx slab
        ),
        compiler_params=_compiler_params(),
        cost_estimate=cost,
    )(x,
      row(p["ln_g"]), row(p["ln_b"]),
      wq, row(p["bq"]), wk, row(p["bk"]), wv, row(p["bv"]),
      wo, row(p["bo"]), row(p["ls"]),
      row(p["ln2_g"]), row(p["ln2_b"]),
      w1, row(p["b1"]), w2, row(p["b2"]))


# ---------------------------------------------------------------------------
# TransformerBlock forward (absolute positional encoding + layer stack)
# ---------------------------------------------------------------------------
def absolute_positional_encoding(max_len, d_model):
    position = jnp.arange(max_len, dtype=jnp.float32)[:, None]
    div_term = jnp.exp(jnp.arange(0, d_model, 2, dtype=jnp.float32)
                       * (-math.log(10000.0) / d_model))
    pe = jnp.zeros((max_len, d_model), jnp.float32)
    pe = pe.at[:, 0::2].set(jnp.sin(position * div_term))
    n_odd = pe[:, 1::2].shape[1]
    pe = pe.at[:, 1::2].set(jnp.cos(position * div_term[:n_odd]))
    return pe


def transformer_block(x, pe, layer_params, *, num_heads):
    S = x.shape[1]
    x = x + pe[None, :S, :]   # absolute PE add (one-off elementwise glue in JAX)
    for p in layer_params:
        x = transformer_layer(x, p, num_heads=num_heads)
    return x


# ---------------------------------------------------------------------------
# Pure-JAX f32 reference of the same forward semantics (eval mode)
# ---------------------------------------------------------------------------
def _layernorm_ref(x, g, b):
    mu = x.mean(-1, keepdims=True)
    var = ((x - mu) ** 2).mean(-1, keepdims=True)
    return (x - mu) / jnp.sqrt(var + _LN_EPS) * g + b


def transformer_block_ref(x, pe, layer_params, *, num_heads):
    B, S, D = x.shape
    H, dk = num_heads, D // num_heads
    x = x + pe[None, :S, :]
    for p in layer_params:
        h = _layernorm_ref(x, p["ln_g"], p["ln_b"])
        q = (h @ p["wq"] + p["bq"]).reshape(B, S, H, dk).transpose(0, 2, 1, 3)
        k = (h @ p["wk"] + p["bk"]).reshape(B, S, H, dk).transpose(0, 2, 1, 3)
        v = (h @ p["wv"] + p["bv"]).reshape(B, S, H, dk).transpose(0, 2, 1, 3)
        sc = jnp.einsum("bhqd,bhkd->bhqk", q, k) / math.sqrt(dk)
        att = jax.nn.softmax(sc, axis=-1)
        ctx = jnp.einsum("bhqk,bhkd->bhqd", att, v).transpose(0, 2, 1, 3).reshape(B, S, D)
        x = x + (ctx @ p["wo"] + p["bo"]) * p["ls"]
        h2 = _layernorm_ref(x, p["ln2_g"], p["ln2_b"])
        x = x + jnp.maximum(h2 @ p["w1"] + p["b1"], 0.0) @ p["w2"] + p["b2"]
    return x


# ---------------------------------------------------------------------------
# Demo / self-check
# ---------------------------------------------------------------------------
def _make_layer_params(key, d_model, ff_dims):
    ks = jax.random.split(key, 12)

    def lin(kw, kb, fan_in, fan_out):
        w = jax.random.normal(kw, (fan_in, fan_out), jnp.float32) * 0.05
        b = jax.random.normal(kb, (fan_out,), jnp.float32) * 0.05
        return w, b

    wq, bq = lin(ks[0], ks[1], d_model, d_model)
    wk, bk = lin(ks[2], ks[3], d_model, d_model)
    wv, bv = lin(ks[4], ks[5], d_model, d_model)
    wo, bo = lin(ks[6], ks[7], d_model, d_model)
    w1, b1 = lin(ks[8], ks[9], d_model, ff_dims)
    w2, b2 = lin(ks[10], ks[11], ff_dims, d_model)
    return dict(
        ln_g=jnp.ones((d_model,), jnp.float32),   # MHA internal LayerNorm (torch init)
        ln_b=jnp.zeros((d_model,), jnp.float32),
        wq=wq, bq=bq, wk=wk, bk=bk, wv=wv, bv=bv, wo=wo, bo=bo,
        ls=jnp.full((d_model,), 1e-4, jnp.float32),   # LayerScale init 0.0001
        ln2_g=jnp.ones((d_model,), jnp.float32),      # TransformerLayer.norm2
        ln2_b=jnp.zeros((d_model,), jnp.float32),
        w1=w1, b1=b1, w2=w2, b2=b2,
    )


if __name__ == "__main__":
    # Small deterministic setup consistent with the module defaults:
    # d_model=32, ff_dims=4*d_model, num_heads=4, num_layers=2, batch=2, seq=8.
    B, S, d_model = 2, 8, 32
    ff_dims = 4 * d_model
    num_heads = 4
    num_layers = 2
    max_len = 64

    key = jax.random.PRNGKey(0)
    key, kx = jax.random.split(key)
    x = jax.random.normal(kx, (B, S, d_model), dtype=jnp.float32)

    layer_keys = jax.random.split(key, num_layers)
    params = [_make_layer_params(k, d_model, ff_dims) for k in layer_keys]

    pe = absolute_positional_encoding(max_len, d_model)

    fwd = jax.jit(functools.partial(transformer_block, num_heads=num_heads))
    out = jax.block_until_ready(fwd(x, pe, params))

    ref = transformer_block_ref(x, pe, params, num_heads=num_heads)
    assert out.shape == (B, S, d_model)
    max_err = float(jnp.max(jnp.abs(out - ref)))
    # bf16 MXU operands (f32 accumulate) => looser tolerance than pure f32.
    assert jnp.allclose(out, ref, atol=2e-2, rtol=2e-2), max_err

    print("KERNEL_OK")
</pallas_src>

<mosaic_0001>
module attributes {stable_mosaic.version = 11 : i64} {
  func.func @_probe_kernel(%arg0: i32, %arg1: memref<8x128xf32, #tpu.memory_space<vmem>>, %arg2: memref<8x128xf32, #tpu.memory_space<vmem>>) attributes {dimension_semantics = [#tpu.dimension_semantics<arbitrary>], iteration_bounds = array<i64: 2>, scalar_prefetch = 0 : i64, scratch_operands = 0 : i64, tpu.core_type = #tpu.core_type<tc>, window_params = [{pipeline_mode = #tpu.pipeline_mode<synchronous>, transform_indices = @transform_0, window_bounds = array<i64: 8, 128>}, {pipeline_mode = #tpu.pipeline_mode<synchronous>, transform_indices = @transform_1, window_bounds = array<i64: 8, 128>}]} {
    %c0 = arith.constant 0 : index
    %c0_0 = arith.constant 0 : index
    %0 = vector.load %arg1[%c0, %c0_0] : memref<8x128xf32, #tpu.memory_space<vmem>>, vector<8x128xf32>
    %cst = arith.constant 1.000000e+00 : f32
    %1 = vector.broadcast %cst : f32 to vector<8x128xf32>
    %2 = arith.addf %0, %1 : vector<8x128xf32>
    %c0_1 = arith.constant 0 : index
    %c0_2 = arith.constant 0 : index
    %3 = vector.load %arg2[%c0_1, %c0_2] : memref<8x128xf32, #tpu.memory_space<vmem>>, vector<8x128xf32>
    tpu.vector_store %arg2[%c0_1, %c0_2], %2 {strides = array<i32>} : memref<8x128xf32, #tpu.memory_space<vmem>>, vector<8x128xf32>,
    return
  }
  func.func @transform_0(%arg0: i32) -> (i32, i32) {
    %c0_i32 = arith.constant 0 : i32
    %c0_i32_0 = arith.constant 0 : i32
    %c0_i32_1 = arith.constant 0 : i32
    return %c0_i32, %c0_i32_0 : i32, i32
  }
  func.func @transform_1(%arg0: i32) -> (i32, i32) {
    %c0_i32 = arith.constant 0 : i32
    %c0_i32_0 = arith.constant 0 : i32
    %c0_i32_1 = arith.constant 0 : i32
    return %c0_i32, %c0_i32_0 : i32, i32
  }
}

module attributes {stable_mosaic.version = 11 : i64} {
  func.func @layer_kernel(%arg0: i32, %arg1: memref<1x8x32xf32, #tpu.memory_space<vmem>>, %arg2: memref<1x32xf32, #tpu.memory_space<vmem>>, %arg3: memref<1x32xf32, #tpu.memory_space<vmem>>, %arg4: memref<32x32xbf16, #tpu.memory_space<vmem>>, %arg5: memref<1x32xf32, #tpu.memory_space<vmem>>, %arg6: memref<32x32xbf16, #tpu.memory_space<vmem>>, %arg7: memref<1x32xf32, #tpu.memory_space<vmem>>, %arg8: memref<32x32xbf16, #tpu.memory_space<vmem>>, %arg9: memref<1x32xf32, #tpu.memory_space<vmem>>, %arg10: memref<32x32xbf16, #tpu.memory_space<vmem>>, %arg11: memref<1x32xf32, #tpu.memory_space<vmem>>, %arg12: memref<1x32xf32, #tpu.memory_space<vmem>>, %arg13: memref<1x32xf32, #tpu.memory_space<vmem>>, %arg14: memref<1x32xf32, #tpu.memory_space<vmem>>, %arg15: memref<32x128xbf16, #tpu.memory_space<vmem>>, %arg16: memref<1x128xf32, #tpu.memory_space<vmem>>, %arg17: memref<128x32xbf16, #tpu.memory_space<vmem>>, %arg18: memref<1x32xf32, #tpu.memory_space<vmem>>, %arg19: memref<1x8x32xf32, #tpu.memory_space<vmem>>, %arg20: memref<8x32xbf16, #tpu.memory_space<vmem>>) attributes {dimension_semantics = [#tpu.dimension_semantics<parallel>], iteration_bounds = array<i64: 2>, scalar_prefetch = 0 : i64, scratch_operands = 1 : i64, tpu.core_type = #tpu.core_type<tc>, window_params = [{transform_indices = @transform_0, window_bounds = array<i64: 1, 8, 32>}, {pipeline_mode = #tpu.pipeline_mode<synchronous>, transform_indices = @transform_1, window_bounds = array<i64: 1, 32>}, {pipeline_mode = #tpu.pipeline_mode<synchronous>, transform_indices = @transform_2, window_bounds = array<i64: 1, 32>}, {pipeline_mode = #tpu.pipeline_mode<synchronous>, transform_indices = @transform_3, window_bounds = array<i64: 32, 32>}, {pipeline_mode = #tpu.pipeline_mode<synchronous>, transform_indices = @transform_4, window_bounds = array<i64: 1, 32>}, {pipeline_mode = #tpu.pipeline_mode<synchronous>, transform_indices = @transform_5, window_bounds = array<i64: 32, 32>}, {pipeline_mode = #tpu.pipeline_mode<synchronous>, transform_indices = @transform_6, window_bounds = array<i64: 1, 32>}, {pipeline_mode = #tpu.pipeline_mode<synchronous>, transform_indices = @transform_7, window_bounds = array<i64: 32, 32>}, {pipeline_mode = #tpu.pipeline_mode<synchronous>, transform_indices = @transform_8, window_bounds = array<i64: 1, 32>}, {pipeline_mode = #tpu.pipeline_mode<synchronous>, transform_indices = @transform_9, window_bounds = array<i64: 32, 32>}, {pipeline_mode = #tpu.pipeline_mode<synchronous>, transform_indices = @transform_10, window_bounds = array<i64: 1, 32>}, {pipeline_mode = #tpu.pipeline_mode<synchronous>, transform_indices = @transform_11, window_bounds = array<i64: 1, 32>}, {pipeline_mode = #tpu.pipeline_mode<synchronous>, transform_indices = @transform_12, window_bounds = array<i64: 1, 32>}, {pipeline_mode = #tpu.pipeline_mode<synchronous>, transform_indices = @transform_13, window_bounds = array<i64: 1, 32>}, {pipeline_mode = #tpu.pipeline_mode<synchronous>, transform_indices = @transform_14, window_bounds = array<i64: 32, 128>}, {pipeline_mode = #tpu.pipeline_mode<synchronous>, transform_indices = @transform_15, window_bounds = array<i64: 1, 128>}, {pipeline_mode = #tpu.pipeline_mode<synchronous>, transform_indices = @transform_16, window_bounds = array<i64: 128, 32>}, {pipeline_mode = #tpu.pipeline_mode<synchronous>, transform_indices = @transform_17, window_bounds = array<i64: 1, 32>}, {transform_indices = @transform_18, window_bounds = array<i64: 1, 8, 32>}]} {
    %c0 = arith.constant 0 : index
    %c0_0 = arith.constant 0 : index
    %c0_1 = arith.constant 0 : index
    %0 = vector.load %arg1[%c0, %c0_0, %c0_1] : memref<1x8x32xf32, #tpu.memory_space<vmem>>, vector<1x8x32xf32>
    %1 = vector.shape_cast %0 : vector<1x8x32xf32> to vector<8x32xf32>
    %cst = arith.constant dense<0.000000e+00> : vector<8xf32>
    %2 = vector.multi_reduction <add>, %1, %cst [1] : vector<8x32xf32> to vector<8xf32>
    %3 = vector.shape_cast %2 : vector<8xf32> to vector<8x1xf32>
    %cst_2 = arith.constant 3.200000e+01 : f32
    %4 = vector.broadcast %cst_2 : f32 to vector<8x1xf32>
    %5 = arith.divf %3, %4 : vector<8x1xf32>
    %6 = vector.broadcast %5 : vector<8x1xf32> to vector<8x32xf32>
    %7 = arith.subf %1, %6 : vector<8x32xf32>
    %8 = arith.mulf %7, %7 : vector<8x32xf32>
    %cst_3 = arith.constant dense<0.000000e+00> : vector<8xf32>
    %9 = vector.multi_reduction <add>, %8, %cst_3 [1] : vector<8x32xf32> to vector<8xf32>
    %10 = vector.shape_cast %9 : vector<8xf32> to vector<8x1xf32>
    %cst_4 = arith.constant 3.200000e+01 : f32
    %11 = vector.broadcast %cst_4 : f32 to vector<8x1xf32>
    %12 = arith.divf %10, %11 : vector<8x1xf32>
    %13 = vector.broadcast %5 : vector<8x1xf32> to vector<8x32xf32>
    %14 = arith.subf %1, %13 : vector<8x32xf32>
    %cst_5 = arith.constant 9.99999974E-6 : f32
    %15 = vector.broadcast %cst_5 : f32 to vector<8x1xf32>
    %16 = arith.addf %12, %15 : vector<8x1xf32>
    %17 = math.rsqrt %16 : vector<8x1xf32>
    %18 = vector.broadcast %17 : vector<8x1xf32> to vector<8x32xf32>
    %19 = arith.mulf %14, %18 : vector<8x32xf32>
    %c0_6 = arith.constant 0 : index
    %c0_7 = arith.constant 0 : index
    %20 = vector.load %arg2[%c0_6, %c0_7] : memref<1x32xf32, #tpu.memory_space<vmem>>, vector<1x32xf32>
    %21 = vector.broadcast %20 : vector<1x32xf32> to vector<8x32xf32>
    %22 = arith.mulf %19, %21 : vector<8x32xf32>
    %c0_8 = arith.constant 0 : index
    %c0_9 = arith.constant 0 : index
    %23 = vector.load %arg3[%c0_8, %c0_9] : memref<1x32xf32, #tpu.memory_space<vmem>>, vector<1x32xf32>
    %24 = vector.broadcast %23 : vector<1x32xf32> to vector<8x32xf32>
    %25 = arith.addf %22, %24 : vector<8x32xf32>
    %26 = arith.truncf %25 : vector<8x32xf32> to vector<8x32xbf16>
    %c0_10 = arith.constant 0 : index
    %c0_11 = arith.constant 0 : index
    %27 = vector.load %arg4[%c0_10, %c0_11] : memref<32x32xbf16, #tpu.memory_space<vmem>>, vector<32x32xbf16>
    %cst_12 = arith.constant dense<0.000000e+00> : vector<8x32xf32>
    %28 = tpu.matmul %26, %27, %cst_12 {dimension_numbers = #tpu.dot_dimension_numbers<[1], [0], [0], [1], [0, 0, 1, 1], [], []>} : vector<8x32xbf16>, vector<32x32xbf16>, vector<8x32xf32> -> vector<8x32xf32>
    %c0_13 = arith.constant 0 : index
    %c0_14 = arith.constant 0 : index
    %29 = vector.load %arg5[%c0_13, %c0_14] : memref<1x32xf32, #tpu.memory_space<vmem>>, vector<1x32xf32>
    %30 = vector.broadcast %29 : vector<1x32xf32> to vector<8x32xf32>
    %31 = arith.addf %28, %30 : vector<8x32xf32>
    %32 = arith.truncf %31 : vector<8x32xf32> to vector<8x32xbf16>
    %c0_15 = arith.constant 0 : index
    %c0_16 = arith.constant 0 : index
    %33 = vector.load %arg6[%c0_15, %c0_16] : memref<32x32xbf16, #tpu.memory_space<vmem>>, vector<32x32xbf16>
    %cst_17 = arith.constant dense<0.000000e+00> : vector<8x32xf32>
    %34 = tpu.matmul %26, %33, %cst_17 {dimension_numbers = #tpu.dot_dimension_numbers<[1], [0], [0], [1], [0, 0, 1, 1], [], []>} : vector<8x32xbf16>, vector<32x32xbf16>, vector<8x32xf32> -> vector<8x32xf32>
    %c0_18 = arith.constant 0 : index
    %c0_19 = arith.constant 0 : index
    %35 = vector.load %arg7[%c0_18, %c0_19] : memref<1x32xf32, #tpu.memory_space<vmem>>, vector<1x32xf32>
    %36 = vector.broadcast %35 : vector<1x32xf32> to vector<8x32xf32>
    %37 = arith.addf %34, %36 : vector<8x32xf32>
    %38 = arith.truncf %37 : vector<8x32xf32> to vector<8x32xbf16>
    %c0_20 = arith.constant 0 : index
    %c0_21 = arith.constant 0 : index
    %39 = vector.load %arg8[%c0_20, %c0_21] : memref<32x32xbf16, #tpu.memory_space<vmem>>, vector<32x32xbf16>
    %cst_22 = arith.constant dense<0.000000e+00> : vector<8x32xf32>
    %40 = tpu.matmul %26, %39, %cst_22 {dimension_numbers = #tpu.dot_dimension_numbers<[1], [0], [0], [1], [0, 0, 1, 1], [], []>} : vector<8x32xbf16>, vector<32x32xbf16>, vector<8x32xf32> -> vector<8x32xf32>
    %c0_23 = arith.constant 0 : index
    %c0_24 = arith.constant 0 : index
    %41 = vector.load %arg9[%c0_23, %c0_24] : memref<1x32xf32, #tpu.memory_space<vmem>>, vector<1x32xf32>
    %42 = vector.broadcast %41 : vector<1x32xf32> to vector<8x32xf32>
    %43 = arith.addf %40, %42 : vector<8x32xf32>
    %44 = arith.truncf %43 : vector<8x32xf32> to vector<8x32xbf16>
    %45 = vector.extract_strided_slice %32 {offsets = [0, 0], sizes = [8, 8], strides = [1, 1]} : vector<8x32xbf16> to vector<8x8xbf16>
    %46 = vector.extract_strided_slice %38 {offsets = [0, 0], sizes = [8, 8], strides = [1, 1]} : vector<8x32xbf16> to vector<8x8xbf16>
    %47 = vector.extract_strided_slice %44 {offsets = [0, 0], sizes = [8, 8], strides = [1, 1]} : vector<8x32xbf16> to vector<8x8xbf16>
    %cst_25 = arith.constant dense<0.000000e+00> : vector<8x8xf32>
    %48 = tpu.matmul %45, %46, %cst_25 {dimension_numbers = #tpu.dot_dimension_numbers<[1], [1], [0], [0], [0, 0, 1, 0], [], []>} : vector<8x8xbf16>, vector<8x8xbf16>, vector<8x8xf32> -> vector<8x8xf32>
    %cst_26 = arith.constant 0.353553385 : f32
    %49 = vector.broadcast %cst_26 : f32 to vector<8x8xf32>
    %50 = arith.mulf %48, %49 : vector<8x8xf32>
    %cst_27 = arith.constant dense<0xFF800000> : vector<8xf32>
    %51 = vector.multi_reduction <maximumf>, %50, %cst_27 [1] : vector<8x8xf32> to vector<8xf32>
    %52 = vector.shape_cast %51 : vector<8xf32> to vector<8x1xf32>
    %53 = vector.broadcast %52 : vector<8x1xf32> to vector<8x8xf32>
    %54 = arith.subf %50, %53 : vector<8x8xf32>
    %55 = math.exp %54 : vector<8x8xf32>
    %cst_28 = arith.constant dense<0.000000e+00> : vector<8xf32>
    %56 = vector.multi_reduction <add>, %55, %cst_28 [1] : vector<8x8xf32> to vector<8xf32>
    %57 = vector.shape_cast %56 : vector<8xf32> to vector<8x1xf32>
    %58 = tpu.reciprocal %57 : vector<8x1xf32> -> vector<8x1xf32>
    %59 = vector.broadcast %58 : vector<8x1xf32> to vector<8x8xf32>
    %60 = arith.mulf %55, %59 : vector<8x8xf32>
    %61 = arith.truncf %60 : vector<8x8xf32> to vector<8x8xbf16>
    %cst_29 = arith.constant dense<0.000000e+00> : vector<8x8xf32>
    %62 = tpu.matmul %61, %47, %cst_29 {dimension_numbers = #tpu.dot_dimension_numbers<[1], [0], [0], [1], [0, 0, 1, 1], [], []>} : vector<8x8xbf16>, vector<8x8xbf16>, vector<8x8xf32> -> vector<8x8xf32>
    %63 = arith.truncf %62 : vector<8x8xf32> to vector<8x8xbf16>
    %c0_30 = arith.constant 0 : index
    %c0_31 = arith.constant 0 : index
    %64 = vector.load %arg20[%c0_30, %c0_31] : memref<8x32xbf16, #tpu.memory_space<vmem>>, vector<8x8xbf16>
    tpu.vector_store %arg20[%c0_30, %c0_31], %63 {strides = array<i32>} : memref<8x32xbf16, #tpu.memory_space<vmem>>, vector<8x8xbf16>,
    %65 = vector.extract_strided_slice %32 {offsets = [0, 8], sizes = [8, 8], strides = [1, 1]} : vector<8x32xbf16> to vector<8x8xbf16>
    %66 = vector.extract_strided_slice %38 {offsets = [0, 8], sizes = [8, 8], strides = [1, 1]} : vector<8x32xbf16> to vector<8x8xbf16>
    %67 = vector.extract_strided_slice %44 {offsets = [0, 8], sizes = [8, 8], strides = [1, 1]} : vector<8x32xbf16> to vector<8x8xbf16>
    %cst_32 = arith.constant dense<0.000000e+00> : vector<8x8xf32>
    %68 = tpu.matmul %65, %66, %cst_32 {dimension_numbers = #tpu.dot_dimension_numbers<[1], [1], [0], [0], [0, 0, 1, 0], [], []>} : vector<8x8xbf16>, vector<8x8xbf16>, vector<8x8xf32> -> vector<8x8xf32>
    %cst_33 = arith.constant 0.353553385 : f32
    %69 = vector.broadcast %cst_33 : f32 to vector<8x8xf32>
    %70 = arith.mulf %68, %69 : vector<8x8xf32>
    %cst_34 = arith.constant dense<0xFF800000> : vector<8xf32>
    %71 = vector.multi_reduction <maximumf>, %70, %cst_34 [1] : vector<8x8xf32> to vector<8xf32>
    %72 = vector.shape_cast %71 : vector<8xf32> to vector<8x1xf32>
    %73 = vector.broadcast %72 : vector<8x1xf32> to vector<8x8xf32>
    %74 = arith.subf %70, %73 : vector<8x8xf32>
    %75 = math.exp %74 : vector<8x8xf32>
    %cst_35 = arith.constant dense<0.000000e+00> : vector<8xf32>
    %76 = vector.multi_reduction <add>, %75, %cst_35 [1] : vector<8x8xf32> to vector<8xf32>
    %77 = vector.shape_cast %76 : vector<8xf32> to vector<8x1xf32>
    %78 = tpu.reciprocal %77 : vector<8x1xf32> -> vector<8x1xf32>
    %79 = vector.broadcast %78 : vector<8x1xf32> to vector<8x8xf32>
    %80 = arith.mulf %75, %79 : vector<8x8xf32>
    %81 = arith.truncf %80 : vector<8x8xf32> to vector<8x8xbf16>
    %cst_36 = arith.constant dense<0.000000e+00> : vector<8x8xf32>
    %82 = tpu.matmul %81, %67, %cst_36 {dimension_numbers = #tpu.dot_dimension_numbers<[1], [0], [0], [1], [0, 0, 1, 1], [], []>} : vector<8x8xbf16>, vector<8x8xbf16>, vector<8x8xf32> -> vector<8x8xf32>
    %83 = arith.truncf %82 : vector<8x8xf32> to vector<8x8xbf16>
    %c0_37 = arith.constant 0 : index
    %c8 = arith.constant 8 : index
    %84 = vector.load %arg20[%c0_37, %c8] : memref<8x32xbf16, #tpu.memory_space<vmem>>, vector<8x8xbf16>
    tpu.vector_store %arg20[%c0_37, %c8], %83 {strides = array<i32>} : memref<8x32xbf16, #tpu.memory_space<vmem>>, vector<8x8xbf16>,
    %85 = vector.extract_strided_slice %32 {offsets = [0, 16], sizes = [8, 8], strides = [1, 1]} : vector<8x32xbf16> to vector<8x8xbf16>
    %86 = vector.extract_strided_slice %38 {offsets = [0, 16], sizes = [8, 8], strides = [1, 1]} : vector<8x32xbf16> to vector<8x8xbf16>
    %87 = vector.extract_strided_slice %44 {offsets = [0, 16], sizes = [8, 8], strides = [1, 1]} : vector<8x32xbf16> to vector<8x8xbf16>
    %cst_38 = arith.constant dense<0.000000e+00> : vector<8x8xf32>
    %88 = tpu.matmul %85, %86, %cst_38 {dimension_numbers = #tpu.dot_dimension_numbers<[1], [1], [0], [0], [0, 0, 1, 0], [], []>} : vector<8x8xbf16>, vector<8x8xbf16>, vector<8x8xf32> -> vector<8x8xf32>
    %cst_39 = arith.constant 0.353553385 : f32
    %89 = vector.broadcast %cst_39 : f32 to vector<8x8xf32>
    %90 = arith.mulf %88, %89 : vector<8x8xf32>
    %cst_40 = arith.constant dense<0xFF800000> : vector<8xf32>
    %91 = vector.multi_reduction <maximumf>, %90, %cst_40 [1] : vector<8x8xf32> to vector<8xf32>
    %92 = vector.shape_cast %91 : vector<8xf32> to vector<8x1xf32>
    %93 = vector.broadcast %92 : vector<8x1xf32> to vector<8x8xf32>
    %94 = arith.subf %90, %93 : vector<8x8xf32>
    %95 = math.exp %94 : vector<8x8xf32>
    %cst_41 = arith.constant dense<0.000000e+00> : vector<8xf32>
    %96 = vector.multi_reduction <add>, %95, %cst_41 [1] : vector<8x8xf32> to vector<8xf32>
    %97 = vector.shape_cast %96 : vector<8xf32> to vector<8x1xf32>
    %98 = tpu.reciprocal %97 : vector<8x1xf32> -> vector<8x1xf32>
    %99 = vector.broadcast %98 : vector<8x1xf32> to vector<8x8xf32>
    %100 = arith.mulf %95, %99 : vector<8x8xf32>
    %101 = arith.truncf %100 : vector<8x8xf32> to vector<8x8xbf16>
    %cst_42 = arith.constant dense<0.000000e+00> : vector<8x8xf32>
    %102 = tpu.matmul %101, %87, %cst_42 {dimension_numbers = #tpu.dot_dimension_numbers<[1], [0], [0], [1], [0, 0, 1, 1], [], []>} : vector<8x8xbf16>, vector<8x8xbf16>, vector<8x8xf32> -> vector<8x8xf32>
    %103 = arith.truncf %102 : vector<8x8xf32> to vector<8x8xbf16>
    %c0_43 = arith.constant 0 : index
    %c16 = arith.constant 16 : index
    %104 = vector.load %arg20[%c0_43, %c16] : memref<8x32xbf16, #tpu.memory_space<vmem>>, vector<8x8xbf16>
    tpu.vector_store %arg20[%c0_43, %c16], %103 {strides = array<i32>} : memref<8x32xbf16, #tpu.memory_space<vmem>>, vector<8x8xbf16>,
    %105 = vector.extract_strided_slice %32 {offsets = [0, 24], sizes = [8, 8], strides = [1, 1]} : vector<8x32xbf16> to vector<8x8xbf16>
    %106 = vector.extract_strided_slice %38 {offsets = [0, 24], sizes = [8, 8], strides = [1, 1]} : vector<8x32xbf16> to vector<8x8xbf16>
    %107 = vector.extract_strided_slice %44 {offsets = [0, 24], sizes = [8, 8], strides = [1, 1]} : vector<8x32xbf16> to vector<8x8xbf16>
    %cst_44 = arith.constant dense<0.000000e+00> : vector<8x8xf32>
    %108 = tpu.matmul %105, %106, %cst_44 {dimension_numbers = #tpu.dot_dimension_numbers<[1], [1], [0], [0], [0, 0, 1, 0], [], []>} : vector<8x8xbf16>, vector<8x8xbf16>, vector<8x8xf32> -> vector<8x8xf32>
    %cst_45 = arith.constant 0.353553385 : f32
    %109 = vector.broadcast %cst_45 : f32 to vector<8x8xf32>
    %110 = arith.mulf %108, %109 : vector<8x8xf32>
    %cst_46 = arith.constant dense<0xFF800000> : vector<8xf32>
    %111 = vector.multi_reduction <maximumf>, %110, %cst_46 [1] : vector<8x8xf32> to vector<8xf32>
    %112 = vector.shape_cast %111 : vector<8xf32> to vector<8x1xf32>
    %113 = vector.broadcast %112 : vector<8x1xf32> to vector<8x8xf32>
    %114 = arith.subf %110, %113 : vector<8x8xf32>
    %115 = math.exp %114 : vector<8x8xf32>
    %cst_47 = arith.constant dense<0.000000e+00> : vector<8xf32>
    %116 = vector.multi_reduction <add>, %115, %cst_47 [1] : vector<8x8xf32> to vector<8xf32>
    %117 = vector.shape_cast %116 : vector<8xf32> to vector<8x1xf32>
    %118 = tpu.reciprocal %117 : vector<8x1xf32> -> vector<8x1xf32>
    %119 = vector.broadcast %118 : vector<8x1xf32> to vector<8x8xf32>
    %120 = arith.mulf %115, %119 : vector<8x8xf32>
    %121 = arith.truncf %120 : vector<8x8xf32> to vector<8x8xbf16>
    %cst_48 = arith.constant dense<0.000000e+00> : vector<8x8xf32>
    %122 = tpu.matmul %121, %107, %cst_48 {dimension_numbers = #tpu.dot_dimension_numbers<[1], [0], [0], [1], [0, 0, 1, 1], [], []>} : vector<8x8xbf16>, vector<8x8xbf16>, vector<8x8xf32> -> vector<8x8xf32>
    %123 = arith.truncf %122 : vector<8x8xf32> to vector<8x8xbf16>
    %c0_49 = arith.constant 0 : index
    %c24 = arith.constant 24 : index
    %124 = vector.load %arg20[%c0_49, %c24] : memref<8x32xbf16, #tpu.memory_space<vmem>>, vector<8x8xbf16>
    tpu.vector_store %arg20[%c0_49, %c24], %123 {strides = array<i32>} : memref<8x32xbf16, #tpu.memory_space<vmem>>, vector<8x8xbf16>,
    %c0_50 = arith.constant 0 : index
    %c0_51 = arith.constant 0 : index
    %125 = vector.load %arg20[%c0_50, %c0_51] : memref<8x32xbf16, #tpu.memory_space<vmem>>, vector<8x32xbf16>
    %c0_52 = arith.constant 0 : index
    %c0_53 = arith.constant 0 : index
    %126 = vector.load %arg10[%c0_52, %c0_53] : memref<32x32xbf16, #tpu.memory_space<vmem>>, vector<32x32xbf16>
    %cst_54 = arith.constant dense<0.000000e+00> : vector<8x32xf32>
    %127 = tpu.matmul %125, %126, %cst_54 {dimension_numbers = #tpu.dot_dimension_numbers<[1], [0], [0], [1], [0, 0, 1, 1], [], []>} : vector<8x32xbf16>, vector<32x32xbf16>, vector<8x32xf32> -> vector<8x32xf32>
    %c0_55 = arith.constant 0 : index
    %c0_56 = arith.constant 0 : index
    %128 = vector.load %arg11[%c0_55, %c0_56] : memref<1x32xf32, #tpu.memory_space<vmem>>, vector<1x32xf32>
    %129 = vector.broadcast %128 : vector<1x32xf32> to vector<8x32xf32>
    %130 = arith.addf %127, %129 : vector<8x32xf32>
    %c0_57 = arith.constant 0 : index
    %c0_58 = arith.constant 0 : index
    %131 = vector.load %arg12[%c0_57, %c0_58] : memref<1x32xf32, #tpu.memory_space<vmem>>, vector<1x32xf32>
    %132 = vector.broadcast %131 : vector<1x32xf32> to vector<8x32xf32>
    %133 = arith.mulf %130, %132 : vector<8x32xf32>
    %134 = arith.addf %1, %133 : vector<8x32xf32>
    %cst_59 = arith.constant dense<0.000000e+00> : vector<8xf32>
    %135 = vector.multi_reduction <add>, %134, %cst_59 [1] : vector<8x32xf32> to vector<8xf32>
    %136 = vector.shape_cast %135 : vector<8xf32> to vector<8x1xf32>
    %cst_60 = arith.constant 3.200000e+01 : f32
    %137 = vector.broadcast %cst_60 : f32 to vector<8x1xf32>
    %138 = arith.divf %136, %137 : vector<8x1xf32>
    %139 = vector.broadcast %138 : vector<8x1xf32> to vector<8x32xf32>
    %140 = arith.subf %134, %139 : vector<8x32xf32>
    %141 = arith.mulf %140, %140 : vector<8x32xf32>
    %cst_61 = arith.constant dense<0.000000e+00> : vector<8xf32>
    %142 = vector.multi_reduction <add>, %141, %cst_61 [1] : vector<8x32xf32> to vector<8xf32>
    %143 = vector.shape_cast %142 : vector<8xf32> to vector<8x1xf32>
    %cst_62 = arith.constant 3.200000e+01 : f32
    %144 = vector.broadcast %cst_62 : f32 to vector<8x1xf32>
    %145 = arith.divf %143, %144 : vector<8x1xf32>
    %146 = vector.broadcast %138 : vector<8x1xf32> to vector<8x32xf32>
    %147 = arith.subf %134, %146 : vector<8x32xf32>
    %cst_63 = arith.constant 9.99999974E-6 : f32
    %148 = vector.broadcast %cst_63 : f32 to vector<8x1xf32>
    %149 = arith.addf %145, %148 : vector<8x1xf32>
    %150 = math.rsqrt %149 : vector<8x1xf32>
    %151 = vector.broadcast %150 : vector<8x1xf32> to vector<8x32xf32>
    %152 = arith.mulf %147, %151 : vector<8x32xf32>
    %c0_64 = arith.constant 0 : index
    %c0_65 = arith.constant 0 : index
    %153 = vector.load %arg13[%c0_64, %c0_65] : memref<1x32xf32, #tpu.memory_space<vmem>>, vector<1x32xf32>
    %154 = vector.broadcast %153 : vector<1x32xf32> to vector<8x32xf32>
    %155 = arith.mulf %152, %154 : vector<8x32xf32>
    %c0_66 = arith.constant 0 : index
    %c0_67 = arith.constant 0 : index
    %156 = vector.load %arg14[%c0_66, %c0_67] : memref<1x32xf32, #tpu.memory_space<vmem>>, vector<1x32xf32>
    %157 = vector.broadcast %156 : vector<1x32xf32> to vector<8x32xf32>
    %158 = arith.addf %155, %157 : vector<8x32xf32>
    %159 = arith.truncf %158 : vector<8x32xf32> to vector<8x32xbf16>
    %c0_68 = arith.constant 0 : index
    %c0_69 = arith.constant 0 : index
    %160 = vector.load %arg15[%c0_68, %c0_69] : memref<32x128xbf16, #tpu.memory_space<vmem>>, vector<32x128xbf16>
    %cst_70 = arith.constant dense<0.000000e+00> : vector<8x128xf32>
    %161 = tpu.matmul %159, %160, %cst_70 {dimension_numbers = #tpu.dot_dimension_numbers<[1], [0], [0], [1], [0, 0, 1, 1], [], []>} : vector<8x32xbf16>, vector<32x128xbf16>, vector<8x128xf32> -> vector<8x128xf32>
    %c0_71 = arith.constant 0 : index
    %c0_72 = arith.constant 0 : index
    %162 = vector.load %arg16[%c0_71, %c0_72] : memref<1x128xf32, #tpu.memory_space<vmem>>, vector<1x128xf32>
    %163 = vector.broadcast %162 : vector<1x128xf32> to vector<8x128xf32>
    %164 = arith.addf %161, %163 : vector<8x128xf32>
    %cst_73 = arith.constant 0.000000e+00 : f32
    %165 = vector.broadcast %cst_73 : f32 to vector<8x128xf32>
    %166 = arith.maximumf %164, %165 : vector<8x128xf32>
    %167 = arith.truncf %166 : vector<8x128xf32> to vector<8x128xbf16>
    %c0_74 = arith.constant 0 : index
    %c0_75 = arith.constant 0 : index
    %168 = vector.load %arg17[%c0_74, %c0_75] : memref<128x32xbf16, #tpu.memory_space<vmem>>, vector<128x32xbf16>
    %cst_76 = arith.constant dense<0.000000e+00> : vector<8x32xf32>
    %169 = tpu.matmul %167, %168, %cst_76 {dimension_numbers = #tpu.dot_dimension_numbers<[1], [0], [0], [1], [0, 0, 1, 1], [], []>} : vector<8x128xbf16>, vector<128x32xbf16>, vector<8x32xf32> -> vector<8x32xf32>
    %c0_77 = arith.constant 0 : index
    %c0_78 = arith.constant 0 : index
    %170 = vector.load %arg18[%c0_77, %c0_78] : memref<1x32xf32, #tpu.memory_space<vmem>>, vector<1x32xf32>
    %171 = vector.broadcast %170 : vector<1x32xf32> to vector<8x32xf32>
    %172 = arith.addf %169, %171 : vector<8x32xf32>
    %173 = arith.addf %134, %172 : vector<8x32xf32>
    %c0_79 = arith.constant 0 : index
    %c0_80 = arith.constant 0 : index
    %c0_81 = arith.constant 0 : index
    %174 = vector.load %arg19[%c0_79, %c0_80, %c0_81] : memref<1x8x32xf32, #tpu.memory_space<vmem>>, vector<1x8x32xf32>
    %175 = vector.shape_cast %174 : vector<1x8x32xf32> to vector<8x32xf32>
    %176 = vector.shape_cast %173 : vector<8x32xf32> to vector<1x8x32xf32>
    tpu.vector_store %arg19[%c0_79, %c0_80, %c0_81], %176 {strides = array<i32>} : memref<1x8x32xf32, #tpu.memory_space<vmem>>, vector<1x8x32xf32>,
    return
  }
  func.func @transform_0(%arg0: i32) -> (i32, i32, i32) {
    %c0_i32 = arith.constant 0 : i32
    %c0_i32_0 = arith.constant 0 : i32
    %c0_i32_1 = arith.constant 0 : i32
    return %arg0, %c0_i32, %c0_i32_0 : i32, i32, i32
  }
  func.func @transform_1(%arg0: i32) -> (i32, i32) {
    %c0_i32 = arith.constant 0 : i32
    %c0_i32_0 = arith.constant 0 : i32
    %c0_i32_1 = arith.constant 0 : i32
    return %c0_i32, %c0_i32_0 : i32, i32
  }
  func.func @transform_2(%arg0: i32) -> (i32, i32) {
    %c0_i32 = arith.constant 0 : i32
    %c0_i32_0 = arith.constant 0 : i32
    %c0_i32_1 = arith.constant 0 : i32
    return %c0_i32, %c0_i32_0 : i32, i32
  }
  func.func @transform_3(%arg0: i32) -> (i32, i32) {
    %c0_i32 = arith.constant 0 : i32
    %c0_i32_0 = arith.constant 0 : i32
    %c0_i32_1 = arith.constant 0 : i32
    return %c0_i32, %c0_i32_0 : i32, i32
  }
  func.func @transform_4(%arg0: i32) -> (i32, i32) {
    %c0_i32 = arith.constant 0 : i32
    %c0_i32_0 = arith.constant 0 : i32
    %c0_i32_1 = arith.constant 0 : i32
    return %c0_i32, %c0_i32_0 : i32, i32
  }
  func.func @transform_5(%arg0: i32) -> (i32, i32) {
    %c0_i32 = arith.constant 0 : i32
    %c0_i32_0 = arith.constant 0 : i32
    %c0_i32_1 = arith.constant 0 : i32
    return %c0_i32, %c0_i32_0 : i32, i32
  }
  func.func @transform_6(%arg0: i32) -> (i32, i32) {
    %c0_i32 = arith.constant 0 : i32
    %c0_i32_0 = arith.constant 0 : i32
    %c0_i32_1 = arith.constant 0 : i32
    return %c0_i32, %c0_i32_0 : i32, i32
  }
  func.func @transform_7(%arg0: i32) -> (i32, i32) {
    %c0_i32 = arith.constant 0 : i32
    %c0_i32_0 = arith.constant 0 : i32
    %c0_i32_1 = arith.constant 0 : i32
    return %c0_i32, %c0_i32_0 : i32, i32
  }
  func.func @transform_8(%arg0: i32) -> (i32, i32) {
    %c0_i32 = arith.constant 0 : i32
    %c0_i32_0 = arith.constant 0 : i32
    %c0_i32_1 = arith.constant 0 : i32
    return %c0_i32, %c0_i32_0 : i32, i32
  }
  func.func @transform_9(%arg0: i32) -> (i32, i32) {
    %c0_i32 = arith.constant 0 : i32
    %c0_i32_0 = arith.constant 0 : i32
    %c0_i32_1 = arith.constant 0 : i32
    return %c0_i32, %c0_i32_0 : i32, i32
  }
  func.func @transform_10(%arg0: i32) -> (i32, i32) {
    %c0_i32 = arith.constant 0 : i32
    %c0_i32_0 = arith.constant 0 : i32
    %c0_i32_1 = arith.constant 0 : i32
    return %c0_i32, %c0_i32_0 : i32, i32
  }
  func.func @transform_11(%arg0: i32) -> (i32, i32) {
    %c0_i32 = arith.constant 0 : i32
    %c0_i32_0 = arith.constant 0 : i32
    %c0_i32_1 = arith.constant 0 : i32
    return %c0_i32, %c0_i32_0 : i32, i32
  }
  func.func @transform_12(%arg0: i32) -> (i32, i32) {
    %c0_i32 = arith.constant 0 : i32
    %c0_i32_0 = arith.constant 0 : i32
    %c0_i32_1 = arith.constant 0 : i32
    return %c0_i32, %c0_i32_0 : i32, i32
  }
  func.func @transform_13(%arg0: i32) -> (i32, i32) {
    %c0_i32 = arith.constant 0 : i32
    %c0_i32_0 = arith.constant 0 : i32
    %c0_i32_1 = arith.constant 0 : i32
    return %c0_i32, %c0_i32_0 : i32, i32
  }
  func.func @transform_14(%arg0: i32) -> (i32, i32) {
    %c0_i32 = arith.constant 0 : i32
    %c0_i32_0 = arith.constant 0 : i32
    %c0_i32_1 = arith.constant 0 : i32
    return %c0_i32, %c0_i32_0 : i32, i32
  }
  func.func @transform_15(%arg0: i32) -> (i32, i32) {
    %c0_i32 = arith.constant 0 : i32
    %c0_i32_0 = arith.constant 0 : i32
    %c0_i32_1 = arith.constant 0 : i32
    return %c0_i32, %c0_i32_0 : i32, i32
  }
  func.func @transform_16(%arg0: i32) -> (i32, i32) {
    %c0_i32 = arith.constant 0 : i32
    %c0_i32_0 = arith.constant 0 : i32
    %c0_i32_1 = arith.constant 0 : i32
    return %c0_i32, %c0_i32_0 : i32, i32
  }
  func.func @transform_17(%arg0: i32) -> (i32, i32) {
    %c0_i32 = arith.constant 0 : i32
    %c0_i32_0 = arith.constant 0 : i32
    %c0_i32_1 = arith.constant 0 : i32
    return %c0_i32, %c0_i32_0 : i32, i32
  }
  func.func @transform_18(%arg0: i32) -> (i32, i32, i32) {
    %c0_i32 = arith.constant 0 : i32
    %c0_i32_0 = arith.constant 0 : i32
    %c0_i32_1 = arith.constant 0 : i32
    return %arg0, %c0_i32, %c0_i32_0 : i32, i32, i32
  }
}

module attributes {stable_mosaic.version = 11 : i64} {
  func.func @layer_kernel(%arg0: i32, %arg1: memref<1x8x32xf32, #tpu.memory_space<vmem>>, %arg2: memref<1x32xf32, #tpu.memory_space<vmem>>, %arg3: memref<1x32xf32, #tpu.memory_space<vmem>>, %arg4: memref<32x32xbf16, #tpu.memory_space<vmem>>, %arg5: memref<1x32xf32, #tpu.memory_space<vmem>>, %arg6: memref<32x32xbf16, #tpu.memory_space<vmem>>, %arg7: memref<1x32xf32, #tpu.memory_space<vmem>>, %arg8: memref<32x32xbf16, #tpu.memory_space<vmem>>, %arg9: memref<1x32xf32, #tpu.memory_space<vmem>>, %arg10: memref<32x32xbf16, #tpu.memory_space<vmem>>, %arg11: memref<1x32xf32, #tpu.memory_space<vmem>>, %arg12: memref<1x32xf32, #tpu.memory_space<vmem>>, %arg13: memref<1x32xf32, #tpu.memory_space<vmem>>, %arg14: memref<1x32xf32, #tpu.memory_space<vmem>>, %arg15: memref<32x128xbf16, #tpu.memory_space<vmem>>, %arg16: memref<1x128xf32, #tpu.memory_space<vmem>>, %arg17: memref<128x32xbf16, #tpu.memory_space<vmem>>, %arg18: memref<1x32xf32, #tpu.memory_space<vmem>>, %arg19: memref<1x8x32xf32, #tpu.memory_space<vmem>>, %arg20: memref<8x32xbf16, #tpu.memory_space<vmem>>) attributes {dimension_semantics = [#tpu.dimension_semantics<parallel>], iteration_bounds = array<i64: 2>, scalar_prefetch = 0 : i64, scratch_operands = 1 : i64, tpu.core_type = #tpu.core_type<tc>, window_params = [{transform_indices = @transform_0, window_bounds = array<i64: 1, 8, 32>}, {pipeline_mode = #tpu.pipeline_mode<synchronous>, transform_indices = @transform_1, window_bounds = array<i64: 1, 32>}, {pipeline_mode = #tpu.pipeline_mode<synchronous>, transform_indices = @transform_2, window_bounds = array<i64: 1, 32>}, {pipeline_mode = #tpu.pipeline_mode<synchronous>, transform_indices = @transform_3, window_bounds = array<i64: 32, 32>}, {pipeline_mode = #tpu.pipeline_mode<synchronous>, transform_indices = @transform_4, window_bounds = array<i64: 1, 32>}, {pipeline_mode = #tpu.pipeline_mode<synchronous>, transform_indices = @transform_5, window_bounds = array<i64: 32, 32>}, {pipeline_mode = #tpu.pipeline_mode<synchronous>, transform_indices = @transform_6, window_bounds = array<i64: 1, 32>}, {pipeline_mode = #tpu.pipeline_mode<synchronous>, transform_indices = @transform_7, window_bounds = array<i64: 32, 32>}, {pipeline_mode = #tpu.pipeline_mode<synchronous>, transform_indices = @transform_8, window_bounds = array<i64: 1, 32>}, {pipeline_mode = #tpu.pipeline_mode<synchronous>, transform_indices = @transform_9, window_bounds = array<i64: 32, 32>}, {pipeline_mode = #tpu.pipeline_mode<synchronous>, transform_indices = @transform_10, window_bounds = array<i64: 1, 32>}, {pipeline_mode = #tpu.pipeline_mode<synchronous>, transform_indices = @transform_11, window_bounds = array<i64: 1, 32>}, {pipeline_mode = #tpu.pipeline_mode<synchronous>, transform_indices = @transform_12, window_bounds = array<i64: 1, 32>}, {pipeline_mode = #tpu.pipeline_mode<synchronous>, transform_indices = @transform_13, window_bounds = array<i64: 1, 32>}, {pipeline_mode = #tpu.pipeline_mode<synchronous>, transform_indices = @transform_14, window_bounds = array<i64: 32, 128>}, {pipeline_mode = #tpu.pipeline_mode<synchronous>, transform_indices = @transform_15, window_bounds = array<i64: 1, 128>}, {pipeline_mode = #tpu.pipeline_mode<synchronous>, transform_indices = @transform_16, window_bounds = array<i64: 128, 32>}, {pipeline_mode = #tpu.pipeline_mode<synchronous>, transform_indices = @transform_17, window_bounds = array<i64: 1, 32>}, {transform_indices = @transform_18, window_bounds = array<i64: 1, 8, 32>}]} {
    %c0 = arith.constant 0 : index
    %c0_0 = arith.constant 0 : index
    %c0_1 = arith.constant 0 : index
    %0 = vector.load %arg1[%c0, %c0_0, %c0_1] : memref<1x8x32xf32, #tpu.memory_space<vmem>>, vector<1x8x32xf32>
    %1 = vector.shape_cast %0 : vector<1x8x32xf32> to vector<8x32xf32>
    %cst = arith.constant dense<0.000000e+00> : vector<8xf32>
    %2 = vector.multi_reduction <add>, %1, %cst [1] : vector<8x32xf32> to vector<8xf32>
    %3 = vector.shape_cast %2 : vector<8xf32> to vector<8x1xf32>
    %cst_2 = arith.constant 3.200000e+01 : f32
    %4 = vector.broadcast %cst_2 : f32 to vector<8x1xf32>
    %5 = arith.divf %3, %4 : vector<8x1xf32>
    %6 = vector.broadcast %5 : vector<8x1xf32> to vector<8x32xf32>
    %7 = arith.subf %1, %6 : vector<8x32xf32>
    %8 = arith.mulf %7, %7 : vector<8x32xf32>
    %cst_3 = arith.constant dense<0.000000e+00> : vector<8xf32>
    %9 = vector.multi_reduction <add>, %8, %cst_3 [1] : vector<8x32xf32> to vector<8xf32>
    %10 = vector.shape_cast %9 : vector<8xf32> to vector<8x1xf32>
    %cst_4 = arith.constant 3.200000e+01 : f32
    %11 = vector.broadcast %cst_4 : f32 to vector<8x1xf32>
    %12 = arith.divf %10, %11 : vector<8x1xf32>
    %13 = vector.broadcast %5 : vector<8x1xf32> to vector<8x32xf32>
    %14 = arith.subf %1, %13 : vector<8x32xf32>
    %cst_5 = arith.constant 9.99999974E-6 : f32
    %15 = vector.broadcast %cst_5 : f32 to vector<8x1xf32>
    %16 = arith.addf %12, %15 : vector<8x1xf32>
    %17 = math.rsqrt %16 : vector<8x1xf32>
    %18 = vector.broadcast %17 : vector<8x1xf32> to vector<8x32xf32>
    %19 = arith.mulf %14, %18 : vector<8x32xf32>
    %c0_6 = arith.constant 0 : index
    %c0_7 = arith.constant 0 : index
    %20 = vector.load %arg2[%c0_6, %c0_7] : memref<1x32xf32, #tpu.memory_space<vmem>>, vector<1x32xf32>
    %21 = vector.broadcast %20 : vector<1x32xf32> to vector<8x32xf32>
    %22 = arith.mulf %19, %21 : vector<8x32xf32>
    %c0_8 = arith.constant 0 : index
    %c0_9 = arith.constant 0 : index
    %23 = vector.load %arg3[%c0_8, %c0_9] : memref<1x32xf32, #tpu.memory_space<vmem>>, vector<1x32xf32>
    %24 = vector.broadcast %23 : vector<1x32xf32> to vector<8x32xf32>
    %25 = arith.addf %22, %24 : vector<8x32xf32>
    %26 = arith.truncf %25 : vector<8x32xf32> to vector<8x32xbf16>
    %c0_10 = arith.constant 0 : index
    %c0_11 = arith.constant 0 : index
    %27 = vector.load %arg4[%c0_10, %c0_11] : memref<32x32xbf16, #tpu.memory_space<vmem>>, vector<32x32xbf16>
    %cst_12 = arith.constant dense<0.000000e+00> : vector<8x32xf32>
    %28 = tpu.matmul %26, %27, %cst_12 {dimension_numbers = #tpu.dot_dimension_numbers<[1], [0], [0], [1], [0, 0, 1, 1], [], []>} : vector<8x32xbf16>, vector<32x32xbf16>, vector<8x32xf32> -> vector<8x32xf32>
    %c0_13 = arith.constant 0 : index
    %c0_14 = arith.constant 0 : index
    %29 = vector.load %arg5[%c0_13, %c0_14] : memref<1x32xf32, #tpu.memory_space<vmem>>, vector<1x32xf32>
    %30 = vector.broadcast %29 : vector<1x32xf32> to vector<8x32xf32>
    %31 = arith.addf %28, %30 : vector<8x32xf32>
    %32 = arith.truncf %31 : vector<8x32xf32> to vector<8x32xbf16>
    %c0_15 = arith.constant 0 : index
    %c0_16 = arith.constant 0 : index
    %33 = vector.load %arg6[%c0_15, %c0_16] : memref<32x32xbf16, #tpu.memory_space<vmem>>, vector<32x32xbf16>
    %cst_17 = arith.constant dense<0.000000e+00> : vector<8x32xf32>
    %34 = tpu.matmul %26, %33, %cst_17 {dimension_numbers = #tpu.dot_dimension_numbers<[1], [0], [0], [1], [0, 0, 1, 1], [], []>} : vector<8x32xbf16>, vector<32x32xbf16>, vector<8x32xf32> -> vector<8x32xf32>
    %c0_18 = arith.constant 0 : index
    %c0_19 = arith.constant 0 : index
    %35 = vector.load %arg7[%c0_18, %c0_19] : memref<1x32xf32, #tpu.memory_space<vmem>>, vector<1x32xf32>
    %36 = vector.broadcast %35 : vector<1x32xf32> to vector<8x32xf32>
    %37 = arith.addf %34, %36 : vector<8x32xf32>
    %38 = arith.truncf %37 : vector<8x32xf32> to vector<8x32xbf16>
    %c0_20 = arith.constant 0 : index
    %c0_21 = arith.constant 0 : index
    %39 = vector.load %arg8[%c0_20, %c0_21] : memref<32x32xbf16, #tpu.memory_space<vmem>>, vector<32x32xbf16>
    %cst_22 = arith.constant dense<0.000000e+00> : vector<8x32xf32>
    %40 = tpu.matmul %26, %39, %cst_22 {dimension_numbers = #tpu.dot_dimension_numbers<[1], [0], [0], [1], [0, 0, 1, 1], [], []>} : vector<8x32xbf16>, vector<32x32xbf16>, vector<8x32xf32> -> vector<8x32xf32>
    %c0_23 = arith.constant 0 : index
    %c0_24 = arith.constant 0 : index
    %41 = vector.load %arg9[%c0_23, %c0_24] : memref<1x32xf32, #tpu.memory_space<vmem>>, vector<1x32xf32>
    %42 = vector.broadcast %41 : vector<1x32xf32> to vector<8x32xf32>
    %43 = arith.addf %40, %42 : vector<8x32xf32>
    %44 = arith.truncf %43 : vector<8x32xf32> to vector<8x32xbf16>
    %45 = vector.extract_strided_slice %32 {offsets = [0, 0], sizes = [8, 8], strides = [1, 1]} : vector<8x32xbf16> to vector<8x8xbf16>
    %46 = vector.extract_strided_slice %38 {offsets = [0, 0], sizes = [8, 8], strides = [1, 1]} : vector<8x32xbf16> to vector<8x8xbf16>
    %47 = vector.extract_strided_slice %44 {offsets = [0, 0], sizes = [8, 8], strides = [1, 1]} : vector<8x32xbf16> to vector<8x8xbf16>
    %cst_25 = arith.constant dense<0.000000e+00> : vector<8x8xf32>
    %48 = tpu.matmul %45, %46, %cst_25 {dimension_numbers = #tpu.dot_dimension_numbers<[1], [1], [0], [0], [0, 0, 1, 0], [], []>} : vector<8x8xbf16>, vector<8x8xbf16>, vector<8x8xf32> -> vector<8x8xf32>
    %cst_26 = arith.constant 0.353553385 : f32
    %49 = vector.broadcast %cst_26 : f32 to vector<8x8xf32>
    %50 = arith.mulf %48, %49 : vector<8x8xf32>
    %cst_27 = arith.constant dense<0xFF800000> : vector<8xf32>
    %51 = vector.multi_reduction <maximumf>, %50, %cst_27 [1] : vector<8x8xf32> to vector<8xf32>
    %52 = vector.shape_cast %51 : vector<8xf32> to vector<8x1xf32>
    %53 = vector.broadcast %52 : vector<8x1xf32> to vector<8x8xf32>
    %54 = arith.subf %50, %53 : vector<8x8xf32>
    %55 = math.exp %54 : vector<8x8xf32>
    %cst_28 = arith.constant dense<0.000000e+00> : vector<8xf32>
    %56 = vector.multi_reduction <add>, %55, %cst_28 [1] : vector<8x8xf32> to vector<8xf32>
    %57 = vector.shape_cast %56 : vector<8xf32> to vector<8x1xf32>
    %58 = tpu.reciprocal %57 : vector<8x1xf32> -> vector<8x1xf32>
    %59 = vector.broadcast %58 : vector<8x1xf32> to vector<8x8xf32>
    %60 = arith.mulf %55, %59 : vector<8x8xf32>
    %61 = arith.truncf %60 : vector<8x8xf32> to vector<8x8xbf16>
    %cst_29 = arith.constant dense<0.000000e+00> : vector<8x8xf32>
    %62 = tpu.matmul %61, %47, %cst_29 {dimension_numbers = #tpu.dot_dimension_numbers<[1], [0], [0], [1], [0, 0, 1, 1], [], []>} : vector<8x8xbf16>, vector<8x8xbf16>, vector<8x8xf32> -> vector<8x8xf32>
    %63 = arith.truncf %62 : vector<8x8xf32> to vector<8x8xbf16>
    %c0_30 = arith.constant 0 : index
    %c0_31 = arith.constant 0 : index
    %64 = vector.load %arg20[%c0_30, %c0_31] : memref<8x32xbf16, #tpu.memory_space<vmem>>, vector<8x8xbf16>
    tpu.vector_store %arg20[%c0_30, %c0_31], %63 {strides = array<i32>} : memref<8x32xbf16, #tpu.memory_space<vmem>>, vector<8x8xbf16>,
    %65 = vector.extract_strided_slice %32 {offsets = [0, 8], sizes = [8, 8], strides = [1, 1]} : vector<8x32xbf16> to vector<8x8xbf16>
    %66 = vector.extract_strided_slice %38 {offsets = [0, 8], sizes = [8, 8], strides = [1, 1]} : vector<8x32xbf16> to vector<8x8xbf16>
    %67 = vector.extract_strided_slice %44 {offsets = [0, 8], sizes = [8, 8], strides = [1, 1]} : vector<8x32xbf16> to vector<8x8xbf16>
    %cst_32 = arith.constant dense<0.000000e+00> : vector<8x8xf32>
    %68 = tpu.matmul %65, %66, %cst_32 {dimension_numbers = #tpu.dot_dimension_numbers<[1], [1], [0], [0], [0, 0, 1, 0], [], []>} : vector<8x8xbf16>, vector<8x8xbf16>, vector<8x8xf32> -> vector<8x8xf32>
    %cst_33 = arith.constant 0.353553385 : f32
    %69 = vector.broadcast %cst_33 : f32 to vector<8x8xf32>
    %70 = arith.mulf %68, %69 : vector<8x8xf32>
    %cst_34 = arith.constant dense<0xFF800000> : vector<8xf32>
    %71 = vector.multi_reduction <maximumf>, %70, %cst_34 [1] : vector<8x8xf32> to vector<8xf32>
    %72 = vector.shape_cast %71 : vector<8xf32> to vector<8x1xf32>
    %73 = vector.broadcast %72 : vector<8x1xf32> to vector<8x8xf32>
    %74 = arith.subf %70, %73 : vector<8x8xf32>
    %75 = math.exp %74 : vector<8x8xf32>
    %cst_35 = arith.constant dense<0.000000e+00> : vector<8xf32>
    %76 = vector.multi_reduction <add>, %75, %cst_35 [1] : vector<8x8xf32> to vector<8xf32>
    %77 = vector.shape_cast %76 : vector<8xf32> to vector<8x1xf32>
    %78 = tpu.reciprocal %77 : vector<8x1xf32> -> vector<8x1xf32>
    %79 = vector.broadcast %78 : vector<8x1xf32> to vector<8x8xf32>
    %80 = arith.mulf %75, %79 : vector<8x8xf32>
    %81 = arith.truncf %80 : vector<8x8xf32> to vector<8x8xbf16>
    %cst_36 = arith.constant dense<0.000000e+00> : vector<8x8xf32>
    %82 = tpu.matmul %81, %67, %cst_36 {dimension_numbers = #tpu.dot_dimension_numbers<[1], [0], [0], [1], [0, 0, 1, 1], [], []>} : vector<8x8xbf16>, vector<8x8xbf16>, vector<8x8xf32> -> vector<8x8xf32>
    %83 = arith.truncf %82 : vector<8x8xf32> to vector<8x8xbf16>
    %c0_37 = arith.constant 0 : index
    %c8 = arith.constant 8 : index
    %84 = vector.load %arg20[%c0_37, %c8] : memref<8x32xbf16, #tpu.memory_space<vmem>>, vector<8x8xbf16>
    tpu.vector_store %arg20[%c0_37, %c8], %83 {strides = array<i32>} : memref<8x32xbf16, #tpu.memory_space<vmem>>, vector<8x8xbf16>,
    %85 = vector.extract_strided_slice %32 {offsets = [0, 16], sizes = [8, 8], strides = [1, 1]} : vector<8x32xbf16> to vector<8x8xbf16>
    %86 = vector.extract_strided_slice %38 {offsets = [0, 16], sizes = [8, 8], strides = [1, 1]} : vector<8x32xbf16> to vector<8x8xbf16>
    %87 = vector.extract_strided_slice %44 {offsets = [0, 16], sizes = [8, 8], strides = [1, 1]} : vector<8x32xbf16> to vector<8x8xbf16>
    %cst_38 = arith.constant dense<0.000000e+00> : vector<8x8xf32>
    %88 = tpu.matmul %85, %86, %cst_38 {dimension_numbers = #tpu.dot_dimension_numbers<[1], [1], [0], [0], [0, 0, 1, 0], [], []>} : vector<8x8xbf16>, vector<8x8xbf16>, vector<8x8xf32> -> vector<8x8xf32>
    %cst_39 = arith.constant 0.353553385 : f32
    %89 = vector.broadcast %cst_39 : f32 to vector<8x8xf32>
    %90 = arith.mulf %88, %89 : vector<8x8xf32>
    %cst_40 = arith.constant dense<0xFF800000> : vector<8xf32>
    %91 = vector.multi_reduction <maximumf>, %90, %cst_40 [1] : vector<8x8xf32> to vector<8xf32>
    %92 = vector.shape_cast %91 : vector<8xf32> to vector<8x1xf32>
    %93 = vector.broadcast %92 : vector<8x1xf32> to vector<8x8xf32>
    %94 = arith.subf %90, %93 : vector<8x8xf32>
    %95 = math.exp %94 : vector<8x8xf32>
    %cst_41 = arith.constant dense<0.000000e+00> : vector<8xf32>
    %96 = vector.multi_reduction <add>, %95, %cst_41 [1] : vector<8x8xf32> to vector<8xf32>
    %97 = vector.shape_cast %96 : vector<8xf32> to vector<8x1xf32>
    %98 = tpu.reciprocal %97 : vector<8x1xf32> -> vector<8x1xf32>
    %99 = vector.broadcast %98 : vector<8x1xf32> to vector<8x8xf32>
    %100 = arith.mulf %95, %99 : vector<8x8xf32>
    %101 = arith.truncf %100 : vector<8x8xf32> to vector<8x8xbf16>
    %cst_42 = arith.constant dense<0.000000e+00> : vector<8x8xf32>
    %102 = tpu.matmul %101, %87, %cst_42 {dimension_numbers = #tpu.dot_dimension_numbers<[1], [0], [0], [1], [0, 0, 1, 1], [], []>} : vector<8x8xbf16>, vector<8x8xbf16>, vector<8x8xf32> -> vector<8x8xf32>
    %103 = arith.truncf %102 : vector<8x8xf32> to vector<8x8xbf16>
    %c0_43 = arith.constant 0 : index
    %c16 = arith.constant 16 : index
    %104 = vector.load %arg20[%c0_43, %c16] : memref<8x32xbf16, #tpu.memory_space<vmem>>, vector<8x8xbf16>
    tpu.vector_store %arg20[%c0_43, %c16], %103 {strides = array<i32>} : memref<8x32xbf16, #tpu.memory_space<vmem>>, vector<8x8xbf16>,
    %105 = vector.extract_strided_slice %32 {offsets = [0, 24], sizes = [8, 8], strides = [1, 1]} : vector<8x32xbf16> to vector<8x8xbf16>
    %106 = vector.extract_strided_slice %38 {offsets = [0, 24], sizes = [8, 8], strides = [1, 1]} : vector<8x32xbf16> to vector<8x8xbf16>
    %107 = vector.extract_strided_slice %44 {offsets = [0, 24], sizes = [8, 8], strides = [1, 1]} : vector<8x32xbf16> to vector<8x8xbf16>
    %cst_44 = arith.constant dense<0.000000e+00> : vector<8x8xf32>
    %108 = tpu.matmul %105, %106, %cst_44 {dimension_numbers = #tpu.dot_dimension_numbers<[1], [1], [0], [0], [0, 0, 1, 0], [], []>} : vector<8x8xbf16>, vector<8x8xbf16>, vector<8x8xf32> -> vector<8x8xf32>
    %cst_45 = arith.constant 0.353553385 : f32
    %109 = vector.broadcast %cst_45 : f32 to vector<8x8xf32>
    %110 = arith.mulf %108, %109 : vector<8x8xf32>
    %cst_46 = arith.constant dense<0xFF800000> : vector<8xf32>
    %111 = vector.multi_reduction <maximumf>, %110, %cst_46 [1] : vector<8x8xf32> to vector<8xf32>
    %112 = vector.shape_cast %111 : vector<8xf32> to vector<8x1xf32>
    %113 = vector.broadcast %112 : vector<8x1xf32> to vector<8x8xf32>
    %114 = arith.subf %110, %113 : vector<8x8xf32>
    %115 = math.exp %114 : vector<8x8xf32>
    %cst_47 = arith.constant dense<0.000000e+00> : vector<8xf32>
    %116 = vector.multi_reduction <add>, %115, %cst_47 [1] : vector<8x8xf32> to vector<8xf32>
    %117 = vector.shape_cast %116 : vector<8xf32> to vector<8x1xf32>
    %118 = tpu.reciprocal %117 : vector<8x1xf32> -> vector<8x1xf32>
    %119 = vector.broadcast %118 : vector<8x1xf32> to vector<8x8xf32>
    %120 = arith.mulf %115, %119 : vector<8x8xf32>
    %121 = arith.truncf %120 : vector<8x8xf32> to vector<8x8xbf16>
    %cst_48 = arith.constant dense<0.000000e+00> : vector<8x8xf32>
    %122 = tpu.matmul %121, %107, %cst_48 {dimension_numbers = #tpu.dot_dimension_numbers<[1], [0], [0], [1], [0, 0, 1, 1], [], []>} : vector<8x8xbf16>, vector<8x8xbf16>, vector<8x8xf32> -> vector<8x8xf32>
    %123 = arith.truncf %122 : vector<8x8xf32> to vector<8x8xbf16>
    %c0_49 = arith.constant 0 : index
    %c24 = arith.constant 24 : index
    %124 = vector.load %arg20[%c0_49, %c24] : memref<8x32xbf16, #tpu.memory_space<vmem>>, vector<8x8xbf16>
    tpu.vector_store %arg20[%c0_49, %c24], %123 {strides = array<i32>} : memref<8x32xbf16, #tpu.memory_space<vmem>>, vector<8x8xbf16>,
    %c0_50 = arith.constant 0 : index
    %c0_51 = arith.constant 0 : index
    %125 = vector.load %arg20[%c0_50, %c0_51] : memref<8x32xbf16, #tpu.memory_space<vmem>>, vector<8x32xbf16>
    %c0_52 = arith.constant 0 : index
    %c0_53 = arith.constant 0 : index
    %126 = vector.load %arg10[%c0_52, %c0_53] : memref<32x32xbf16, #tpu.memory_space<vmem>>, vector<32x32xbf16>
    %cst_54 = arith.constant dense<0.000000e+00> : vector<8x32xf32>
    %127 = tpu.matmul %125, %126, %cst_54 {dimension_numbers = #tpu.dot_dimension_numbers<[1], [0], [0], [1], [0, 0, 1, 1], [], []>} : vector<8x32xbf16>, vector<32x32xbf16>, vector<8x32xf32> -> vector<8x32xf32>
    %c0_55 = arith.constant 0 : index
    %c0_56 = arith.constant 0 : index
    %128 = vector.load %arg11[%c0_55, %c0_56] : memref<1x32xf32, #tpu.memory_space<vmem>>, vector<1x32xf32>
    %129 = vector.broadcast %128 : vector<1x32xf32> to vector<8x32xf32>
    %130 = arith.addf %127, %129 : vector<8x32xf32>
    %c0_57 = arith.constant 0 : index
    %c0_58 = arith.constant 0 : index
    %131 = vector.load %arg12[%c0_57, %c0_58] : memref<1x32xf32, #tpu.memory_space<vmem>>, vector<1x32xf32>
    %132 = vector.broadcast %131 : vector<1x32xf32> to vector<8x32xf32>
    %133 = arith.mulf %130, %132 : vector<8x32xf32>
    %134 = arith.addf %1, %133 : vector<8x32xf32>
    %cst_59 = arith.constant dense<0.000000e+00> : vector<8xf32>
    %135 = vector.multi_reduction <add>, %134, %cst_59 [1] : vector<8x32xf32> to vector<8xf32>
    %136 = vector.shape_cast %135 : vector<8xf32> to vector<8x1xf32>
    %cst_60 = arith.constant 3.200000e+01 : f32
    %137 = vector.broadcast %cst_60 : f32 to vector<8x1xf32>
    %138 = arith.divf %136, %137 : vector<8x1xf32>
    %139 = vector.broadcast %138 : vector<8x1xf32> to vector<8x32xf32>
    %140 = arith.subf %134, %139 : vector<8x32xf32>
    %141 = arith.mulf %140, %140 : vector<8x32xf32>
    %cst_61 = arith.constant dense<0.000000e+00> : vector<8xf32>
    %142 = vector.multi_reduction <add>, %141, %cst_61 [1] : vector<8x32xf32> to vector<8xf32>
    %143 = vector.shape_cast %142 : vector<8xf32> to vector<8x1xf32>
    %cst_62 = arith.constant 3.200000e+01 : f32
    %144 = vector.broadcast %cst_62 : f32 to vector<8x1xf32>
    %145 = arith.divf %143, %144 : vector<8x1xf32>
    %146 = vector.broadcast %138 : vector<8x1xf32> to vector<8x32xf32>
    %147 = arith.subf %134, %146 : vector<8x32xf32>
    %cst_63 = arith.constant 9.99999974E-6 : f32
    %148 = vector.broadcast %cst_63 : f32 to vector<8x1xf32>
    %149 = arith.addf %145, %148 : vector<8x1xf32>
    %150 = math.rsqrt %149 : vector<8x1xf32>
    %151 = vector.broadcast %150 : vector<8x1xf32> to vector<8x32xf32>
    %152 = arith.mulf %147, %151 : vector<8x32xf32>
    %c0_64 = arith.constant 0 : index
    %c0_65 = arith.constant 0 : index
    %153 = vector.load %arg13[%c0_64, %c0_65] : memref<1x32xf32, #tpu.memory_space<vmem>>, vector<1x32xf32>
    %154 = vector.broadcast %153 : vector<1x32xf32> to vector<8x32xf32>
    %155 = arith.mulf %152, %154 : vector<8x32xf32>
    %c0_66 = arith.constant 0 : index
    %c0_67 = arith.constant 0 : index
    %156 = vector.load %arg14[%c0_66, %c0_67] : memref<1x32xf32, #tpu.memory_space<vmem>>, vector<1x32xf32>
    %157 = vector.broadcast %156 : vector<1x32xf32> to vector<8x32xf32>
    %158 = arith.addf %155, %157 : vector<8x32xf32>
    %159 = arith.truncf %158 : vector<8x32xf32> to vector<8x32xbf16>
    %c0_68 = arith.constant 0 : index
    %c0_69 = arith.constant 0 : index
    %160 = vector.load %arg15[%c0_68, %c0_69] : memref<32x128xbf16, #tpu.memory_space<vmem>>, vector<32x128xbf16>
    %cst_70 = arith.constant dense<0.000000e+00> : vector<8x128xf32>
    %161 = tpu.matmul %159, %160, %cst_70 {dimension_numbers = #tpu.dot_dimension_numbers<[1], [0], [0], [1], [0, 0, 1, 1], [], []>} : vector<8x32xbf16>, vector<32x128xbf16>, vector<8x128xf32> -> vector<8x128xf32>
    %c0_71 = arith.constant 0 : index
    %c0_72 = arith.constant 0 : index
    %162 = vector.load %arg16[%c0_71, %c0_72] : memref<1x128xf32, #tpu.memory_space<vmem>>, vector<1x128xf32>
    %163 = vector.broadcast %162 : vector<1x128xf32> to vector<8x128xf32>
    %164 = arith.addf %161, %163 : vector<8x128xf32>
    %cst_73 = arith.constant 0.000000e+00 : f32
    %165 = vector.broadcast %cst_73 : f32 to vector<8x128xf32>
    %166 = arith.maximumf %164, %165 : vector<8x128xf32>
    %167 = arith.truncf %166 : vector<8x128xf32> to vector<8x128xbf16>
    %c0_74 = arith.constant 0 : index
    %c0_75 = arith.constant 0 : index
    %168 = vector.load %arg17[%c0_74, %c0_75] : memref<128x32xbf16, #tpu.memory_space<vmem>>, vector<128x32xbf16>
    %cst_76 = arith.constant dense<0.000000e+00> : vector<8x32xf32>
    %169 = tpu.matmul %167, %168, %cst_76 {dimension_numbers = #tpu.dot_dimension_numbers<[1], [0], [0], [1], [0, 0, 1, 1], [], []>} : vector<8x128xbf16>, vector<128x32xbf16>, vector<8x32xf32> -> vector<8x32xf32>
    %c0_77 = arith.constant 0 : index
    %c0_78 = arith.constant 0 : index
    %170 = vector.load %arg18[%c0_77, %c0_78] : memref<1x32xf32, #tpu.memory_space<vmem>>, vector<1x32xf32>
    %171 = vector.broadcast %170 : vector<1x32xf32> to vector<8x32xf32>
    %172 = arith.addf %169, %171 : vector<8x32xf32>
    %173 = arith.addf %134, %172 : vector<8x32xf32>
    %c0_79 = arith.constant 0 : index
    %c0_80 = arith.constant 0 : index
    %c0_81 = arith.constant 0 : index
    %174 = vector.load %arg19[%c0_79, %c0_80, %c0_81] : memref<1x8x32xf32, #tpu.memory_space<vmem>>, vector<1x8x32xf32>
    %175 = vector.shape_cast %174 : vector<1x8x32xf32> to vector<8x32xf32>
    %176 = vector.shape_cast %173 : vector<8x32xf32> to vector<1x8x32xf32>
    tpu.vector_store %arg19[%c0_79, %c0_80, %c0_81], %176 {strides = array<i32>} : memref<1x8x32xf32, #tpu.memory_space<vmem>>, vector<1x8x32xf32>,
    return
  }
  func.func @transform_0(%arg0: i32) -> (i32, i32, i32) {
    %c0_i32 = arith.constant 0 : i32
    %c0_i32_0 = arith.constant 0 : i32
    %c0_i32_1 = arith.constant 0 : i32
    return %arg0, %c0_i32, %c0_i32_0 : i32, i32, i32
  }
  func.func @transform_1(%arg0: i32) -> (i32, i32) {
    %c0_i32 = arith.constant 0 : i32
    %c0_i32_0 = arith.constant 0 : i32
    %c0_i32_1 = arith.constant 0 : i32
    return %c0_i32, %c0_i32_0 : i32, i32
  }
  func.func @transform_2(%arg0: i32) -> (i32, i32) {
    %c0_i32 = arith.constant 0 : i32
    %c0_i32_0 = arith.constant 0 : i32
    %c0_i32_1 = arith.constant 0 : i32
    return %c0_i32, %c0_i32_0 : i32, i32
  }
  func.func @transform_3(%arg0: i32) -> (i32, i32) {
    %c0_i32 = arith.constant 0 : i32
    %c0_i32_0 = arith.constant 0 : i32
    %c0_i32_1 = arith.constant 0 : i32
    return %c0_i32, %c0_i32_0 : i32, i32
  }
  func.func @transform_4(%arg0: i32) -> (i32, i32) {
    %c0_i32 = arith.constant 0 : i32
    %c0_i32_0 = arith.constant 0 : i32
    %c0_i32_1 = arith.constant 0 : i32
    return %c0_i32, %c0_i32_0 : i32, i32
  }
  func.func @transform_5(%arg0: i32) -> (i32, i32) {
    %c0_i32 = arith.constant 0 : i32
    %c0_i32_0 = arith.constant 0 : i32
    %c0_i32_1 = arith.constant 0 : i32
    return %c0_i32, %c0_i32_0 : i32, i32
  }
  func.func @transform_6(%arg0: i32) -> (i32, i32) {
    %c0_i32 = arith.constant 0 : i32
    %c0_i32_0 = arith.constant 0 : i32
    %c0_i32_1 = arith.constant 0 : i32
    return %c0_i32, %c0_i32_0 : i32, i32
  }
  func.func @transform_7(%arg0: i32) -> (i32, i32) {
    %c0_i32 = arith.constant 0 : i32
    %c0_i32_0 = arith.constant 0 : i32
    %c0_i32_1 = arith.constant 0 : i32
    return %c0_i32, %c0_i32_0 : i32, i32
  }
  func.func @transform_8(%arg0: i32) -> (i32, i32) {
    %c0_i32 = arith.constant 0 : i32
    %c0_i32_0 = arith.constant 0 : i32
    %c0_i32_1 = arith.constant 0 : i32
    return %c0_i32, %c0_i32_0 : i32, i32
  }
  func.func @transform_9(%arg0: i32) -> (i32, i32) {
    %c0_i32 = arith.constant 0 : i32
    %c0_i32_0 = arith.constant 0 : i32
    %c0_i32_1 = arith.constant 0 : i32
    return %c0_i32, %c0_i32_0 : i32, i32
  }
  func.func @transform_10(%arg0: i32) -> (i32, i32) {
    %c0_i32 = arith.constant 0 : i32
    %c0_i32_0 = arith.constant 0 : i32
    %c0_i32_1 = arith.constant 0 : i32
    return %c0_i32, %c0_i32_0 : i32, i32
  }
  func.func @transform_11(%arg0: i32) -> (i32, i32) {
    %c0_i32 = arith.constant 0 : i32
    %c0_i32_0 = arith.constant 0 : i32
    %c0_i32_1 = arith.constant 0 : i32
    return %c0_i32, %c0_i32_0 : i32, i32
  }
  func.func @transform_12(%arg0: i32) -> (i32, i32) {
    %c0_i32 = arith.constant 0 : i32
    %c0_i32_0 = arith.constant 0 : i32
    %c0_i32_1 = arith.constant 0 : i32
    return %c0_i32, %c0_i32_0 : i32, i32
  }
  func.func @transform_13(%arg0: i32) -> (i32, i32) {
    %c0_i32 = arith.constant 0 : i32
    %c0_i32_0 = arith.constant 0 : i32
    %c0_i32_1 = arith.constant 0 : i32
    return %c0_i32, %c0_i32_0 : i32, i32
  }
  func.func @transform_14(%arg0: i32) -> (i32, i32) {
    %c0_i32 = arith.constant 0 : i32
    %c0_i32_0 = arith.constant 0 : i32
    %c0_i32_1 = arith.constant 0 : i32
    return %c0_i32, %c0_i32_0 : i32, i32
  }
  func.func @transform_15(%arg0: i32) -> (i32, i32) {
    %c0_i32 = arith.constant 0 : i32
    %c0_i32_0 = arith.constant 0 : i32
    %c0_i32_1 = arith.constant 0 : i32
    return %c0_i32, %c0_i32_0 : i32, i32
  }
  func.func @transform_16(%arg0: i32) -> (i32, i32) {
    %c0_i32 = arith.constant 0 : i32
    %c0_i32_0 = arith.constant 0 : i32
    %c0_i32_1 = arith.constant 0 : i32
    return %c0_i32, %c0_i32_0 : i32, i32
  }
  func.func @transform_17(%arg0: i32) -> (i32, i32) {
    %c0_i32 = arith.constant 0 : i32
    %c0_i32_0 = arith.constant 0 : i32
    %c0_i32_1 = arith.constant 0 : i32
    return %c0_i32, %c0_i32_0 : i32, i32
  }
  func.func @transform_18(%arg0: i32) -> (i32, i32, i32) {
    %c0_i32 = arith.constant 0 : i32
    %c0_i32_0 = arith.constant 0 : i32
    %c0_i32_1 = arith.constant 0 : i32
    return %arg0, %c0_i32, %c0_i32_0 : i32, i32, i32
  }
}

</mosaic_0001>

<bundles_post_ra>
// kernel: tpu_custom_call.1
= control target key start
LH: loop header
LB: loop body
LE: loop exit
PB: predicated region body
PF: predicated region fallthrough
CT: control target
= control target key end

     0   :  { %6 = vsyncpa [#allocation3], 0  ;;  %s287_s0 = inlined_call_operand.hbm [shape: f32[8,128], index: 0, kind: input, shape index: {}]   ;;  %s288_s1 = inlined_call_operand.hbm [shape: f32[8,128], index: 1, kind: output, shape index: {}]  }
   0x1   :  { %7 = vsyncpa [#allocation4], 0  ;;  %s270_s6 = smov 0  }
   0x2 LB: > { %s149_s7 = sadd.s32 4294967295, %s256_s6   ;;  %p150_p0 = scmp.ge.s32.totalorder %s256_s6, 1  ;;  %s256_s6 = sphi %s270_s6, %s13_s6  }
   0x3   : > { %p60_p1 = scmp.lt.s32.totalorder %s256_s6, 3  ;;  %s72_s10 = sshll.u32 %s287_s0, 4  ;;  %s73_s10 = int_to_ptr.hbm [resolvable:$true] %s72_s10 }
   0x4   : > { %p170_p3 = scmp.eq.s32.totalorder %s149_s7, 0  ;;  %s258_s11 = smov [#allocation2]  }
   0x5   : > { %p61_p2 = pnand %p150_p0, %p60_p1  ;;  %s74_s12 = sshll.u32 %s258_s11, 4  ;;  %s75_s12 = int_to_ptr.vmem [resolvable:$true] %s74_s12 }
   0x7   : > { %p166_p4 = pneg %p61_p2  ;;  %87 = sbr.rel (%p61_p2) target bundleno = 20 (0x14), region = 24 }
   0x9   : > { %p167_p5 = pnand %p170_p3, %p166_p4 }
   0xb   : > { %169 = dma.hbm_to_vmem [thread:$0]  (!%p167_p5), %s73_s10, 128, %s75_s12, [#allocation3]  }
   0xc   : > { %247 = dma.done.wait (%p170_p3), [#allocation3], 128  }
   0xd   : > { %249 = vsyncadd (%p170_p3), [#allocation3], 4294967168  ;;  %s259_s13 = smov [#allocation5]   ;;  %s109_s17 = sshll.u32 %s288_s1, 4  ;;  %v98_v0 = vld [vmem:[#allocation2] sm:$0xff]  ;;  %s110_s17 = int_to_ptr.hbm [resolvable:$true] %s109_s17 }
   0xe   : > { %s107_s14 = sshll.u32 %s259_s13, 4  ;;  %p172_p6 = scmp.eq.s32.totalorder %s149_s7, 1  ;;  %v99_v1 = vadd.f32 1.0, %v98_v0  ;;  %s108_s14 = int_to_ptr.vmem [resolvable:$true] %s107_s14 }
  0x10   : > { %100 = vst [vmem:[#allocation5] sm:$0xff] %v99_v1 }
  0x11   : > { %163 = dma.vmem_to_hbm [thread:$0]  (%p172_p6), %s108_s14, 128, %s110_s17, [#allocation4]  }
  0x12   : > { %251 = dma.done.wait (%p172_p6), [#allocation4], 128  }
  0x13   : > { %253 = vsyncadd (%p172_p6), [#allocation4], 4294967168 }
  0x14 PF: > { %s13_s6 = sadd.s32 1, %s256_s6  }
  0x15   : > { %p10_p7 = scmp.ge.s32.totalorder %s13_s6, 4  }
  0x17   :  { %12 = sbr.rel (!%p10_p7) target bundleno = 2 (0x2), region = 53 }
  0x1c   :  { %123 = vsyncpa [#allocation3], 1 }
  0x1d   :  { %125 = vsyncpa [#allocation3 + $0x1], 1 }
  0x1e   :  { %126 = vsyncpa [#allocation4], 1 }
  0x1f   :  { %128 = vsyncpa [#allocation4 + $0x1], 1 }

// kernel: transformer_block.2
= control target key start
LH: loop header
LB: loop body
LE: loop exit
PB: predicated region body
PF: predicated region fallthrough
CT: control target
= control target key end

     0   :  { %s1548_s27 = smov 0   ;;  %s1721_s0 = inlined_call_operand.vmem [shape: f32[2,8,32], index: 0, kind: input, shape index: {}]   ;;  %s1722_s1 = inlined_call_operand.vmem [shape: f32[1,32], index: 1, kind: input, shape index: {}]   ;;  %s1723_s2 = inlined_call_operand.vmem [shape: f32[1,32], index: 2, kind: input, shape index: {}]   ;;  %s1724_s3 = inlined_call_operand.vmem [shape: bf16[32,32], index: 3, kind: input, shape index: {}]   ;;  %s1725_s4 = inlined_call_operand.vmem [shape: f32[1,32], index: 4, kind: input, shape index: {}]   ;;  %s1726_s5 = inlined_call_operand.vmem [shape: bf16[32,32], index: 5, kind: input, shape index: {}]   ;;  %s1727_s6 = inlined_call_operand.vmem [shape: f32[1,32], index: 6, kind: input, shape index: {}]   ;;  %s1728_s7 = inlined_call_operand.vmem [shape: bf16[32,32], index: 7, kind: input, shape index: {}]   ;;  %s1729_s8 = inlined_call_operand.vmem [shape: f32[1,32], index: 8, kind: input, shape index: {}]   ;;  %s1730_s9 = inlined_call_operand.vmem [shape: bf16[32,32], index: 9, kind: input, shape index: {}]   ;;  %s1731_s10 = inlined_call_operand.vmem [shape: f32[1,32], index: 10, kind: input, shape index: {}]   ;;  %s1732_s11 = inlined_call_operand.vmem [shape: f32[1,32], index: 11, kind: input, shape index: {}]   ;;  %s1733_s12 = inlined_call_operand.vmem [shape: f32[1,32], index: 12, kind: input, shape index: {}]   ;;  %s1734_s13 = inlined_call_operand.vmem [shape: f32[1,32], index: 13, kind: input, shape index: {}]   ;;  %s1735_s14 = inlined_call_operand.vmem [shape: bf16[32,128], index: 14, kind: input, shape index: {}]   ;;  %s1736_s15 = inlined_call_operand.vmem [shape: f32[1,128], index: 15, kind: input, shape index: {}]   ;;  %s1737_s16 = inlined_call_operand.vmem [shape: bf16[128,32], index: 16, kind: input, shape index: {}]   ;;  %s1738_s17 = inlined_call_operand.vmem [shape: f32[1,32], index: 17, kind: input, shape index: {}]   ;;  %s1739_s18 = inlined_call_operand.vmem [shape: f32[2,8,32], index: 18, kind: output, shape index: {}]  }
   0x1   :  { %1740 = sst [smem:[#allocation3_spill]] %s1721_s0 }
   0x2   :  { %1741 = sst [smem:[#allocation4_spill]] %s1722_s1 }
   0x3   :  { %1742 = sst [smem:[#allocation5_spill]] %s1723_s2 }
   0x4 LB: > { %s1278_s28 = sadd.s32 4294967295, %s1444_s27   ;;  %p1282_p0 = scmp.ge.s32.totalorder %s1444_s27, 1  ;;  %s1444_s27 = sphi %s1548_s27, %s28_s27  }
   0x5   : > { %p511_p1 = scmp.lt.s32.totalorder %s1444_s27, 3 }
   0x7   : > { %p512_p2 = pnand %p1282_p0, %p511_p1 }
   0x8   : > { %p563_p3 = scmp.lt.s32.totalorder (!%p512_p2), %s1278_s28, 1  ;;  %s1743_s19 = sld [smem:[#allocation3_spill]] (!%p512_p2) }
   0x9   : > { %515 = sbr.rel (%p512_p2) target bundleno = 1892 (0x764), region = 92  ;;  %s1744_s22 = sld [smem:[#allocation4_spill]] (!%p512_p2) }
   0xa   : > { %s1745_s24 = sld [smem:[#allocation5_spill]] (!%p512_p2)  ;;  %s1450_s2 = smov (!%p512_p2), 8  }
   0xb   : > { %s1451_s23 = smov (!%p512_p2), 16  }
   0xe   : > { %s1747_s28 = smov (!%p563_p3, %s1278_s28), 1  ;;  %vm573_vm0 = vcmask 261120   ;;  %v1446_v2 = vmov 32.0   ;;  %v1373_v14 = vld [vmem:[%s1724_s3 + $0x8] sm:$0xff]  ;;  %v1372_v16 = vld [vmem:[%s1724_s3] sm:$0xff]  ;;  %vm719_vm5 = vcmask 64512  }
   0xf   : > { %s1283_s29 = sshll.u32 %s1747_s28, 3  ;;  %1416 = vrcp.f32 %v1446_v2  ;;  %v1375_v15 = vld [vmem:[%s1726_s5 + $0x8] sm:$0xff]  ;;  %643 = vmatpush.bf16.msra.mxu0 %v1373_v14  ;;  %v1374_v17 = vld [vmem:[%s1726_s5] sm:$0xff]  ;;  %vm768_vm6 = vcmask 1043456  }
  0x10   : > { %s566_s1 = scalar_lea.vmem %s1743_s19, %s1283_s29  ;;  %677 = vmatpush.bf16.msra.mxu2 %v1375_v15  ;;  %v1377_v18 = vld [vmem:[%s1728_s7 + $0x8] sm:$0xff]  ;;  %v1376_v21 = vld [vmem:[%s1728_s7] sm:$0xff]  ;;  %s1447_s19 = smov 112  }
  0x11   : > { %v1564_v0 = vld [vmem:[%s566_s1] sm:$0xff]  ;;  %s1448_s1 = smov 120   ;;  %s570_s30 = scalar_lea.vmem %s1739_s18, %s1283_s29 }
  0x12   : > { %v574_v1 = vsel %vm573_vm0, %v1564_v0, 0.0  ;;  %v1405_v29 = vld [vmem:[%s1744_s22] ss:$0 sm:$0xff]  ;;  %s1449_s22 = smov 104  }
  0x13   : > { %575 = vadd.xlane.f32.xlu0 %v574_v1  ;;  %644 = vmatpush.bf16.msra.mxu0 %v1372_v16  ;;  %v1406_v32 = vld [vmem:[%s1745_s24] ss:$0 sm:$0xff]  ;;  %s1452_s24 = smov 24  }
  0x14   : > { %678 = vmatpush.bf16.msra.mxu2 %v1374_v17  ;;  %v1407_v36 = vld [vmem:[%s1725_s4] ss:$0 sm:$0xff] }
  0x15   : > { %v1417_v3 = vpop.eup %1416  ;;  %v1408_v40 = vld [vmem:[%s1727_s6] ss:$0 sm:$0xff] }
  0x16   : > { %v578_v4 = vmul.f32 32.0, %v1417_v3  ;;  %vm582_vm1 = vweird.f32 %v1417_v3  ;;  %v1409_v51 = vld [vmem:[%s1729_s8] ss:$0 sm:$0xff] }
  0x18   : > { %v579_v5 = vsub.f32 1.0, %v578_v4  ;;  %711 = vmatpush.bf16.msrb.mxu2 %v1377_v18 }
  0x1a   : > { %v580_v6 = vmul.f32 %v1417_v3, %v579_v5 }
  0x1c   : > { %v581_v7 = vadd.f32 %v1417_v3, %v580_v6  ;;  %712 = vmatpush.bf16.msrb.mxu2 %v1376_v21 }
  0x1e   : > { %v1568_v8 = vsel %vm582_vm1, %v1417_v3, %v581_v7 }
  0x86   : > { %v576_v9 = vpop.xlane.xlu0 %575 }
  0x87   : > { %v584_v10 = vmul.f32 %v1568_v8, %v576_v9 }
  0x89   : > { %v585_v11 = vsub.f32 %v1564_v0, %v584_v10 }
  0x8b   : > { %v586_v12 = vmul.f32 %v585_v11, %v585_v11 }
  0x8d   : > { %v587_v13 = vsel %vm573_vm0, %v586_v12, 0.0 }
  0x8e   : > { %588 = vadd.xlane.f32.xlu0 %v587_v13 }
 0x101   : > { %v589_v19 = vpop.xlane.xlu0 %588 }
 0x102   : > { %v590_v20 = vmul.f32 %v589_v19, %v1568_v8 }
 0x104   : > { %v591_v22 = vadd.f32 1e-05, %v590_v20 }
 0x106   : > { %1418 = vrsqrt.f32 %v591_v22  ;;  %vm598_vm3 = vweird.f32 %v591_v22 }
 0x10c   : > { %v1419_v23 = vpop.eup %1418 }
 0x10d   : > { %v593_v24 = vmul.f32 %v1419_v23, %v591_v22  ;;  %vm599_vm2 = vweird.f32 %v1419_v23 }
 0x10e   : > { %vm600_vm4 = vmor %vm598_vm3, %vm599_vm2 }
 0x10f   : > { %v594_v25 = vmul.f32 %v1419_v23, %v593_v24 }
 0x111   : > { %v595_v26 = vmul.f32 0.5, %v594_v25 }
 0x113   : > { %v596_v27 = vsub.f32 1.5, %v595_v26 }
 0x115   : > { %v597_v28 = vmul.f32 %v1419_v23, %v596_v27 }
 0x117   : > { %v601_v30 = vsel %vm600_vm4, %v1419_v23, %v597_v28 }
 0x118   : > { %v602_v31 = vmul.f32 %v601_v30, %v585_v11 }
 0x11a   : > { %v607_v33 = vmul.f32 %v1405_v29, %v602_v31 }
 0x11c   : > { %v612_v34 = vadd.f32 %v1406_v32, %v607_v33 }
 0x11e   : > { %v613_v35 = vpack.c.bf16 %v612_v34, %v612_v34 }
 0x120   : > { %1293 = vmatmul.msk.bf16.vlgmr.msra.gmra.mxu0 %vm573_vm0, %v613_v35  ;;  %1302 = vmatmul.msk.bf16.vlgmr.msra.gmra.mxu2 %vm573_vm0, %v613_v35 }
 0x130   : > { %1311 = vmatmul.msk.bf16.vlgmr.msrb.gmra.mxu2 %vm573_vm0, %v613_v35 }
 0x19d   : > { %v646_v37 = vpop.f32.mrf.mxu0 }
 0x19e   : > { %v647_v38 = vadd.f32 %v1407_v36, %v646_v37 }
 0x1a0   : > { %v650_v39 = vpack.c.bf16 %v647_v38, %v647_v38 }
 0x1a2   : > { %v789_v41 = vunpack.c.l.b16 %v650_v39 }
 0x1a3   : > { %v680_v42 = vpop.f32.mrf.mxu2 }
 0x1a4   : > { %v790_v43 = vpack.c.b16 %v789_v41, %v789_v41  ;;  %v681_v44 = vadd.f32 %v1408_v40, %v680_v42 }
 0x1a5   : > { %v648_v45 = vpop.f32.mrf.mxu0 }
 0x1a6   : > { %v684_v46 = vpack.c.bf16 %v681_v44, %v681_v44  ;;  %874 = vrot.lane.b32.xlu0 %v790_v43, %s1447_s19 }
 0x1a8   : > { %v794_v47 = vunpack.c.l.b16 %v684_v46  ;;  %v724_v48 = vsel %vm719_vm5, %v684_v46, 0 }
 0x1a9   : > { %733 = vmatpush.bf16.xpose.msra.mxu3 %v724_v48 }
 0x1aa   : > { %v795_v49 = vpack.c.b16 %v794_v47, %v794_v47 }
 0x1ab   : > { %v682_v50 = vpop.f32.mrf.mxu2 }
 0x1ac   : > { %876 = vrot.lane.b32.xlu2 %v795_v49, %s1447_s19  ;;  %796 = vrot.lane.b32.xlu1 %v795_v49, %s1448_s1 }
 0x1b0   : > { %1312 = vmatmul.msk.bf16.vlgmr.msra.gmra.mxu3 %vm719_vm5, %v650_v39 }
 0x1b3   : > { %v714_v52 = vpop.f32.mrf.mxu2 }
 0x1b4   : > { %v715_v53 = vadd.f32 %v1409_v51, %v714_v52  ;;  %953 = vrot.lane.b32.xlu2 %v795_v49, %s1449_s22  ;;  %791 = vrot.lane.b32.xlu1 %v790_v43, %s1448_s1 }
 0x1b6   : > { %v718_v54 = vpack.c.bf16 %v715_v53, %v715_v53 }
 0x1b8   : > { %v770_v55 = vsel %vm768_vm6, %v718_v54, 0  ;;  %v844_v25 = vunpack.c.l.b16 %v718_v54 }
 0x1b9   : > { %779 = vmatpush.bf16.msrb.mxu0 %v770_v55 }
 0x1ba   : > { %v845_v26 = vpack.c.b16 %v844_v25, %v844_v25 }
 0x1bb   : > { %v716_v56 = vpop.f32.mrf.mxu2 }
 0x1bc   : > { %951 = vrot.lane.b32.xlu1 %v790_v43, %s1449_s22 }
 0x206   : > { %v877_v57 = vpop.permute.xlu2 %876 }
 0x207   : > { %v882_v58 = vsel %vm719_vm5, %v877_v57, 0 }
 0x208   : > { %891 = vmatpush.bf16.xpose.msrb.mxu3 %v882_v58 }
 0x20e   : > { %v954_v60 = vpop.permute.xlu2 %953 }
 0x20f   : > { %v959_v63 = vsel %vm719_vm5, %v954_v60, 0 }
 0x218   : > { %v875_v59 = vpop.permute.xlu0 %874 }
 0x219   : > { %1316 = vmatmul.msk.bf16.vlgmr.msrb.gmra.mxu3 %vm719_vm5, %v875_v59 }
 0x21e   : > { %v797_v61 = vpop.permute.xlu1 %796 }
 0x21f   : > { %v802_v62 = vsel %vm719_vm5, %v797_v61, 0 }
 0x220   : > { %811 = vmatpush.bf16.xpose.msra.mxu1 %v802_v62 }
 0x226   : > { %v792_v1 = vpop.permute.xlu1 %791 }
 0x227   : > { %1314 = vmatmul.msk.bf16.vlgmr.msra.gmra.mxu1 %vm719_vm5, %v792_v1 }
 0x228   : > { %968 = vmatpush.bf16.xpose.msrb.mxu1 %v959_v63 }
 0x22e   : > { %v952_v4 = vpop.permute.xlu1 %951 }
 0x233   : > { %v735_v2 = vpop.f32.mrf.mxu3 }
 0x234   : > { %v739_v3 = vmul.f32 0.35355338, %v735_v2 }
 0x236   : > { %v740_v5 = vsel %vm719_vm5, %v739_v3, -inf }
 0x237   : > { %1318 = vmatmul.msk.bf16.vlgmr.msrb.gmra.mxu1 %vm719_vm5, %v952_v4  ;;  %741 = vmax.xlane.f32.xlu1 %v740_v5 }
 0x23b   : > { %v737_v6 = vpop.f32.mrf.mxu3 }
 0x29c   : > { %v893_v7 = vpop.f32.mrf.mxu3 }
 0x29d   : > { %v897_v14 = vmul.f32 0.35355338, %v893_v7 }
 0x29f   : > { %v898_v18 = vsel %vm719_vm5, %v897_v14, -inf }
 0x2a4   : > { %v813_v9 = vpop.f32.mrf.mxu1  ;;  %v895_v10 = vpop.f32.mrf.mxu3 }
 0x2a5   : > { %v817_v11 = vmul.f32 0.35355338, %v813_v9 }
 0x2a7   : > { %v818_v12 = vsel %vm719_vm5, %v817_v11, -inf }
 0x2a8   : > { %819 = vmax.xlane.f32.xlu2 %v818_v12 }
 0x2aa   : > { %v742_v13 = vpop.xlane.xlu1 %741 }
 0x2ab   : > { %v743_v15 = vsub.f32 %v739_v3, %v742_v13 }
 0x2ac   : > { %v815_v16 = vpop.f32.mrf.mxu1 }
 0x2ad   : > { %v744_v17 = vmul.f32 1.442695, %v743_v15 }
 0x2af   : > { %1420 = vpow2.f32 %v744_v17 }
 0x2b0   : > { %899 = vmax.xlane.f32.xlu2 %v898_v18 }
 0x2b4   : > { %v970_v19 = vpop.f32.mrf.mxu1 }
 0x2b5   : > { %v1421_v20 = vpop.eup %1420  ;;  %v974_v21 = vmul.f32 0.35355338, %v970_v19 }
 0x2b6   : > { %v746_v22 = vsel %vm719_vm5, %v1421_v20, 0.0 }
 0x2b7   : > { %747 = vadd.xlane.f32.xlu1 %v746_v22  ;;  %v975_v23 = vsel %vm719_vm5, %v974_v21, -inf }
 0x2b8   : > { %976 = vmax.xlane.f32.xlu0 %v975_v23 }
 0x2bc   : > { %v972_v24 = vpop.f32.mrf.mxu1 }
 0x2d0   : > { %846 = vrot.lane.b32.xlu1 %v845_v26, %s1448_s1 }
 0x31b   : > { %v820_v27 = vpop.xlane.xlu2 %819 }
 0x31c   : > { %v821_v28 = vsub.f32 %v817_v11, %v820_v27 }
 0x31e   : > { %v822_v29 = vmul.f32 1.442695, %v821_v28 }
 0x320   : > { %1422 = vpow2.f32 %v822_v29 }
 0x323   : > { %v900_v30 = vpop.xlane.xlu2 %899 }
 0x324   : > { %v901_v31 = vsub.f32 %v897_v14, %v900_v30 }
 0x326   : > { %v1423_v32 = vpop.eup %1422  ;;  %v902_v33 = vmul.f32 1.442695, %v901_v31 }
 0x327   : > { %v824_v34 = vsel %vm719_vm5, %v1423_v32, 0.0 }
 0x328   : > { %1424 = vpow2.f32 %v902_v33  ;;  %825 = vadd.xlane.f32.xlu2 %v824_v34 }
 0x32a   : > { %v748_v35 = vpop.xlane.xlu1 %747 }
 0x32b   : > { %1426 = vrcp.f32 %v748_v35  ;;  %v977_v36 = vpop.xlane.xlu0 %976  ;;  %v760_v44 = vand.u32 2147483648, %v748_v35  ;;  %v758_v47 = vand.u32 2147483647, %v748_v35  ;;  %vm754_vm8 = vweird.f32 %v748_v35 }
 0x32c   : > { %v978_v37 = vsub.f32 %v974_v21, %v977_v36 }
 0x32d   : > { %v761_v50 = vor.u32 1.1754944e-38, %v760_v44  ;;  %vm759_vm10 = vcmp.eq.f32.partialorder %v758_v47, 8.507059e+37 }
 0x32e   : > { %v1632_v38 = vpop.eup %1424  ;;  %v979_v39 = vmul.f32 1.442695, %v978_v37 }
 0x32f   : > { %v904_v40 = vsel %vm719_vm5, %v1632_v38, 0.0 }
 0x330   : > { %1428 = vpow2.f32 %v979_v39  ;;  %905 = vadd.xlane.f32.xlu0 %v904_v40 }
 0x331   : > { %v1427_v41 = vpop.eup %1426 }
 0x332   : > { %v750_v42 = vmul.f32 %v1427_v41, %v748_v35  ;;  %vm755_vm7 = vweird.f32 %v1427_v41 }
 0x333   : > { %vm756_vm9 = vmor %vm754_vm8, %vm755_vm7 }
 0x334   : > { %v751_v43 = vsub.f32 1.0, %v750_v42 }
 0x336   : > { %v1636_v45 = vpop.eup %1428  ;;  %v752_v46 = vmul.f32 %v1427_v41, %v751_v43 }
 0x337   : > { %v981_v48 = vsel %vm719_vm5, %v1636_v45, 0.0 }
 0x338   : > { %v753_v49 = vadd.f32 %v1427_v41, %v752_v46  ;;  %982 = vadd.xlane.f32.xlu2 %v981_v48 }
 0x33a   : > { %v757_v51 = vsel %vm756_vm9, %v1427_v41, %v753_v49 }
 0x33b   : > { %v762_v52 = vsel %vm759_vm10, %v761_v50, %v757_v51  ;;  %vm786_vm10 = vcmask 60416   ;;  %v1379_v50 = vld [vmem:[%s1730_s9 + $0x8] sm:$0xff]  ;;  %v1378_v51 = vld [vmem:[%s1730_s9] sm:$0xff] }
 0x33c   : > { %v763_v53 = vmul.f32 %v1421_v20, %v762_v52  ;;  %1058 = vmatpush.bf16.msra.mxu3 %v1379_v50 }
 0x33e   : > { %v764_v54 = vpack.c.bf16 %v763_v53, %v763_v53 }
 0x340   : > { %1313 = vmatmul.msk.bf16.vlgmr.msrb.gmra.mxu0 %vm719_vm5, %v764_v54  ;;  %1059 = vmatpush.bf16.msra.mxu3 %v1378_v51 }
 0x342   : > { %v847_v55 = vpop.permute.xlu1 %846 }
 0x343   : > { %v852_v56 = vsel %vm768_vm6, %v847_v55, 0 }
 0x344   : > { %861 = vmatpush.bf16.msra.mxu2 %v852_v56  ;;  %923 = vrot.lane.b32.xlu0 %v845_v26, %s1447_s19  ;;  %v1410_v56 = vld [vmem:[%s1731_s10] ss:$0 sm:$0xff] }
 0x350   : > { %1000 = vrot.lane.b32.xlu2 %v845_v26, %s1449_s22 }
 0x39b   : > { %v826_v57 = vpop.xlane.xlu2 %825 }
 0x39c   : > { %1430 = vrcp.f32 %v826_v57  ;;  %v838_v62 = vand.u32 2147483648, %v826_v57  ;;  %v836_v1 = vand.u32 2147483647, %v826_v57  ;;  %vm832_vm12 = vweird.f32 %v826_v57 }
 0x39e   : > { %v839_v4 = vor.u32 1.1754944e-38, %v838_v62  ;;  %vm837_vm14 = vcmp.eq.f32.partialorder %v836_v1, 8.507059e+37 }
 0x3a2   : > { %v1431_v58 = vpop.eup %1430 }
 0x3a3   : > { %v828_v59 = vmul.f32 %v1431_v58, %v826_v57  ;;  %v906_v60 = vpop.xlane.xlu0 %905  ;;  %vm833_vm11 = vweird.f32 %v1431_v58  ;;  %v1411_v57 = vld [vmem:[%s1732_s11] ss:$0 sm:$0xff] }
 0x3a4   : > { %1432 = vrcp.f32 %v906_v60  ;;  %vm834_vm13 = vmor %vm832_vm12, %vm833_vm11  ;;  %v918_v12 = vand.u32 2147483648, %v906_v60  ;;  %v916_v14 = vand.u32 2147483647, %v906_v60  ;;  %vm912_vm1 = vweird.f32 %v906_v60 }
 0x3a5   : > { %v829_v61 = vsub.f32 1.0, %v828_v59  ;;  %vm1026_vm11 = vcmask 257216  }
 0x3a6   : > { %v919_v18 = vor.u32 1.1754944e-38, %v918_v12  ;;  %vm917_vm3 = vcmp.eq.f32.partialorder %v916_v14, 8.507059e+37  ;;  %v1386_v14 = vld [vmem:[%s1737_s16 + $0x20] sm:$0xff] }
 0x3a7   : > { %v830_v63 = vmul.f32 %v1431_v58, %v829_v61 }
 0x3a9   : > { %v831_v2 = vadd.f32 %v1431_v58, %v830_v63 }
 0x3aa   : > { %v1433_v3 = vpop.eup %1432 }
 0x3ab   : > { %v835_v5 = vsel %vm834_vm13, %v1431_v58, %v831_v2  ;;  %v908_v6 = vmul.f32 %v1433_v3, %v906_v60  ;;  %v983_v7 = vpop.xlane.xlu2 %982  ;;  %vm913_vm15 = vweird.f32 %v1433_v3 }
 0x3ac   : > { %v840_v9 = vsel %vm837_vm14, %v839_v4, %v835_v5  ;;  %1434 = vrcp.f32 %v983_v7  ;;  %vm914_vm2 = vmor %vm912_vm1, %vm913_vm15  ;;  %v995_v26 = vand.u32 2147483648, %v983_v7  ;;  %v993_v29 = vand.u32 2147483647, %v983_v7 }
 0x3ad   : > { %v841_v10 = vmul.f32 %v1423_v32, %v840_v9  ;;  %v909_v11 = vsub.f32 1.0, %v908_v6  ;;  %vm989_vm7 = vweird.f32 %v983_v7  ;;  %v1381_v6 = vld [vmem:[%s1735_s14 + $0x8] sm:$0xff] }
 0x3ae   : > { %v996_v33 = vor.u32 1.1754944e-38, %v995_v26  ;;  %vm994_vm9 = vcmp.eq.f32.partialorder %v993_v29, 8.507059e+37  ;;  %v1383_v29 = vld [vmem:[%s1737_s16 + $0x8] sm:$0xff] }
 0x3af   : > { %v910_v13 = vmul.f32 %v1433_v3, %v909_v11  ;;  %v842_v15 = vpack.c.bf16 %v841_v10, %v841_v10  ;;  %v1388_v11 = vld [vmem:[%s1737_s16 + $0x30] sm:$0xff] }
 0x3b1   : > { %v911_v16 = vadd.f32 %v1433_v3, %v910_v13  ;;  %1315 = vmatmul.msk.bf16.vlgmr.msra.gmra.mxu2 %vm719_vm5, %v842_v15  ;;  %v1387_v13 = vld [vmem:[%s1737_s16 + $0x28] sm:$0xff] }
 0x3b2   : > { %v1435_v17 = vpop.eup %1434 }
 0x3b3   : > { %v915_v19 = vsel %vm914_vm2, %v1433_v3, %v911_v16  ;;  %v985_v20 = vmul.f32 %v1435_v17, %v983_v7  ;;  %v1001_v21 = vpop.permute.xlu2 %1000  ;;  %vm990_vm4 = vweird.f32 %v1435_v17  ;;  %v1389_v7 = vld [vmem:[%s1737_s16 + $0x38] sm:$0xff] }
 0x3b4   : > { %v920_v22 = vsel %vm917_vm3, %v919_v18, %v915_v19  ;;  %v1006_v23 = vsel %vm768_vm6, %v1001_v21, 0  ;;  %vm991_vm8 = vmor %vm989_vm7, %vm990_vm4  ;;  %1210 = vmatpush.bf16.msra.mxu1 %v1389_v7  ;;  %v1384_v19 = vld [vmem:[%s1737_s16 + $0x10] sm:$0xff] }
 0x3b5   : > { %v921_v24 = vmul.f32 %v1632_v38, %v920_v22  ;;  %v986_v25 = vsub.f32 1.0, %v985_v20  ;;  %1015 = vmatpush.bf16.msrb.mxu2 %v1006_v23  ;;  %v1412_v22 = vld [vmem:[%s1733_s12] ss:$0 sm:$0xff] }
 0x3b6   : > { %v924_v27 = vpop.permute.xlu0 %923 }
 0x3b7   : > { %v987_v28 = vmul.f32 %v1435_v17, %v986_v25  ;;  %v929_v30 = vsel %vm768_vm6, %v924_v27, 0  ;;  %v922_v32 = vpack.c.bf16 %v921_v24, %v921_v24  ;;  %vm949_vm6 = vcmask 191616   ;;  %v1413_v25 = vld [vmem:[%s1734_s13] ss:$0 sm:$0xff] }
 0x3b8   : > { %938 = vmatpush.bf16.msra.mxu0 %v929_v30  ;;  %1211 = vmatpush.bf16.msra.mxu1 %v1388_v11  ;;  %v1382_v30 = vld [vmem:[%s1737_s16] sm:$0xff] }
 0x3b9   : > { %v988_v31 = vadd.f32 %v1435_v17, %v987_v28 }
 0x3bb   : > { %v992_v34 = vsel %vm991_vm8, %v1435_v17, %v988_v31  ;;  %1317 = vmatmul.msk.bf16.vlgmr.msra.gmra.mxu0 %vm719_vm5, %v922_v32  ;;  %v1414_v31 = vld [vmem:[%s1736_s15] ss:$0 sm:$0xff] }
 0x3bc   : > { %v997_v35 = vsel %vm994_vm9, %v996_v33, %v992_v34  ;;  %1133 = vmatpush.bf16.msrb.mxu0 %v1381_v6  ;;  %1212 = vmatpush.bf16.msra.mxu1 %v1387_v13 }
 0x3bd   : > { %v998_v36 = vmul.f32 %v1636_v45, %v997_v35  ;;  %v781_v37 = vpop.f32.mrf.mxu0 }
 0x3be   : > { %v785_v38 = vpack.c.bf16 %v781_v37, %v781_v37  ;;  %v1415_v37 = vld [vmem:[%s1738_s17] ss:$0 sm:$0xff] }
 0x3bf   : > { %v999_v39 = vpack.c.bf16 %v998_v36, %v998_v36 }
 0x3c0   : > { %787 = vst.msk [vmem:[#allocation2] sm:$0xf] %vm786_vm10, %v785_v38  ;;  %1213 = vmatpush.bf16.msra.mxu1 %v1386_v14 }
 0x3c1   : > { %1319 = vmatmul.msk.bf16.vlgmr.msrb.gmra.mxu2 %vm719_vm5, %v999_v39  ;;  %vm872_vm5 = vcmask 126016  }
 0x3c5   : > { %v783_v40 = vpop.f32.mrf.mxu0 }
 0x434   : > { %v863_v41 = vpop.f32.mrf.mxu2 }
 0x435   : > { %v867_v42 = vpack.c.bf16 %v863_v41, %v863_v41 }
 0x437   : > { %869 = vrot.lane.b32.xlu1 %v867_v42, %s1450_s2 }
 0x438   : > { %v940_v43 = vpop.f32.mrf.mxu0 }
 0x439   : > { %v944_v44 = vpack.c.bf16 %v940_v43, %v940_v43 }
 0x43b   : > { %946 = vrot.lane.b32.xlu2 %v944_v44, %s1451_s23 }
 0x43c   : > { %v865_v46 = vpop.f32.mrf.mxu2 }
 0x440   : > { %v942_v47 = vpop.f32.mrf.mxu0 }
 0x444   : > { %v1017_v48 = vpop.f32.mrf.mxu2 }
 0x445   : > { %v1021_v45 = vpack.c.bf16 %v1017_v48, %v1017_v48 }
 0x447   : > { %1023 = vrot.lane.b32.xlu0 %v1021_v45, %s1452_s24 }
 0x44c   : > { %v1019_v49 = vpop.f32.mrf.mxu2 }
 0x495   : > { %v947_v53 = vpop.permute.xlu2 %946 }
 0x4a9   : > { %v870_v52 = vpop.permute.xlu1 %869 }
 0x4aa   : > { %873 = vst.msk [vmem:[#allocation2] sm:$0xf] %vm872_vm5, %v870_v52 }
 0x4ab   : > { %950 = vst.msk [vmem:[#allocation2] sm:$0xf] %vm949_vm6, %v947_v53 }
 0x4b9   : > { %v1024_v54 = vpop.permute.xlu0 %1023 }
 0x4ba   : > { %1027 = vst.msk [vmem:[#allocation2] sm:$0xf] %vm1026_vm11, %v1024_v54 }
 0x4c1   : > { %v1028_v55 = vld [vmem:[#allocation2] sm:$0xf] }
 0x4c2   : > { %1328 = vmatmul.msk.bf16.vlgmr.msra.gmra.mxu3 %vm573_vm0, %v1028_v55 }
 0x545   : > { %v1061_v58 = vpop.f32.mrf.mxu3 }
 0x546   : > { %v1062_v59 = vadd.f32 %v1410_v56, %v1061_v58 }
 0x548   : > { %v1069_v60 = vmul.f32 %v1411_v57, %v1062_v59 }
 0x54a   : > { %v1070_v61 = vadd.f32 %v1069_v60, %v1564_v0  ;;  %v1380_v0 = vld [vmem:[%s1735_s14] sm:$0xff] }
 0x54b   : > { %1134 = vmatpush.bf16.msrb.mxu0 %v1380_v0 }
 0x54c   : > { %v1071_v62 = vsel %vm573_vm0, %v1070_v61, 0.0 }
 0x54d   : > { %v1063_v63 = vpop.f32.mrf.mxu3  ;;  %1072 = vadd.xlane.f32.xlu1 %v1071_v62 }
 0x5c0   : > { %v1073_v1 = vpop.xlane.xlu1 %1072 }
 0x5c1   : > { %v1074_v2 = vmul.f32 %v1073_v1, %v1568_v8 }
 0x5c3   : > { %v1075_v3 = vsub.f32 %v1070_v61, %v1074_v2 }
 0x5c5   : > { %v1076_v4 = vmul.f32 %v1075_v3, %v1075_v3 }
 0x5c7   : > { %v1077_v5 = vsel %vm573_vm0, %v1076_v4, 0.0 }
 0x5c8   : > { %1078 = vadd.xlane.f32.xlu2 %v1077_v5 }
 0x63b   : > { %v1079_v9 = vpop.xlane.xlu2 %1078 }
 0x63c   : > { %v1080_v10 = vmul.f32 %v1079_v9, %v1568_v8  ;;  %v1385_v8 = vld [vmem:[%s1737_s16 + $0x18] sm:$0xff] }
 0x63d   : > { %1214 = vmatpush.bf16.msra.mxu1 %v1385_v8 }
 0x63e   : > { %v1081_v12 = vadd.f32 1e-05, %v1080_v10 }
 0x640   : > { %1436 = vrsqrt.f32 %v1081_v12  ;;  %vm1088_vm13 = vweird.f32 %v1081_v12 }
 0x641   : > { %1215 = vmatpush.bf16.msra.mxu1 %v1384_v19 }
 0x645   : > { %1216 = vmatpush.bf16.msra.mxu1 %v1383_v29 }
 0x646   : > { %v1437_v15 = vpop.eup %1436 }
 0x647   : > { %v1083_v16 = vmul.f32 %v1437_v15, %v1081_v12  ;;  %vm1089_vm12 = vweird.f32 %v1437_v15 }
 0x648   : > { %vm1090_vm14 = vmor %vm1088_vm13, %vm1089_vm12 }
 0x649   : > { %v1084_v17 = vmul.f32 %v1437_v15, %v1083_v16  ;;  %1217 = vmatpush.bf16.msra.mxu1 %v1382_v30 }
 0x64b   : > { %v1085_v18 = vmul.f32 0.5, %v1084_v17 }
 0x64d   : > { %v1086_v20 = vsub.f32 1.5, %v1085_v18 }
 0x64f   : > { %v1087_v21 = vmul.f32 %v1437_v15, %v1086_v20 }
 0x651   : > { %v1091_v23 = vsel %vm1090_vm14, %v1437_v15, %v1087_v21 }
 0x652   : > { %v1092_v24 = vmul.f32 %v1091_v23, %v1075_v3 }
 0x654   : > { %v1097_v26 = vmul.f32 %v1412_v22, %v1092_v24 }
 0x656   : > { %v1102_v27 = vadd.f32 %v1413_v25, %v1097_v26 }
 0x658   : > { %v1103_v28 = vpack.c.bf16 %v1102_v27, %v1102_v27 }
 0x65a   : > { %1337 = vmatmul.msk.bf16.vlgmr.msrb.gmra.mxu0 %vm573_vm0, %v1103_v28 }
 0x6d7   : > { %v1136_v32 = vpop.f32.mrf.mxu0 }
 0x6d8   : > { %v1137_v33 = vadd.f32 %v1414_v31, %v1136_v32 }
 0x6da   : > { %v1140_v34 = vmax.f32 %v1137_v33, 0.0 }
 0x6dc   : > { %v1141_v35 = vpack.c.bf16 %v1140_v34, %v1140_v34 }
 0x6de   : > { %1218 = vmatmul.bf16.vlgmr.msra.gmra.mxu1 %v1141_v35 }
 0x6df   : > { %v1138_v36 = vpop.f32.mrf.mxu0 }
 0x75b   : > { %v1219_v38 = vpop.f32.mrf.mxu1 }
 0x75c   : > { %v1220_v39 = vadd.f32 %v1415_v37, %v1219_v38 }
 0x75e   : > { %v1223_v40 = vadd.f32 %v1220_v39, %v1070_v61 }
 0x760   : > { %1224 = vst.msk [vmem:[%s570_s30] sm:$0xff] %vm573_vm0, %v1223_v40 }
 0x763   : > { %v1221_v41 = vpop.f32.mrf.mxu1 }
 0x764 PF: > { %s28_s27 = sadd.s32 1, %s1444_s27  }
 0x765   : > { %p25_p4 = scmp.ge.s32.totalorder %s28_s27, 4  }
 0x767   :  { %27 = sbr.rel (!%p25_p4) target bundleno = 4 (0x4), region = 122 }

// kernel: transformer_block.3
= control target key start
LH: loop header
LB: loop body
LE: loop exit
PB: predicated region body
PF: predicated region fallthrough
CT: control target
= control target key end

     0   :  { %s1897_s0 = inlined_call_operand.vmem [shape: f32[2,8,32], index: 0, kind: input, shape index: {}]   ;;  %s1898_s1 = inlined_call_operand.vmem [shape: f32[1,32], index: 1, kind: input, shape index: {}]   ;;  %s1899_s2 = inlined_call_operand.vmem [shape: f32[1,32], index: 2, kind: input, shape index: {}]   ;;  %s1900_s3 = inlined_call_operand.vmem [shape: bf16[32,32], index: 3, kind: input, shape index: {}]   ;;  %s1901_s4 = inlined_call_operand.vmem [shape: f32[1,32], index: 4, kind: input, shape index: {}]   ;;  %s1902_s5 = inlined_call_operand.vmem [shape: bf16[32,32], index: 5, kind: input, shape index: {}]   ;;  %s1903_s6 = inlined_call_operand.vmem [shape: f32[1,32], index: 6, kind: input, shape index: {}]   ;;  %s1904_s7 = inlined_call_operand.vmem [shape: bf16[32,32], index: 7, kind: input, shape index: {}]   ;;  %s1905_s8 = inlined_call_operand.vmem [shape: f32[1,32], index: 8, kind: input, shape index: {}]   ;;  %s1906_s9 = inlined_call_operand.vmem [shape: bf16[32,32], index: 9, kind: input, shape index: {}]   ;;  %s1907_s10 = inlined_call_operand.vmem [shape: f32[1,32], index: 10, kind: input, shape index: {}]   ;;  %s1908_s11 = inlined_call_operand.vmem [shape: f32[1,32], index: 11, kind: input, shape index: {}]   ;;  %s1909_s12 = inlined_call_operand.vmem [shape: f32[1,32], index: 12, kind: input, shape index: {}]   ;;  %s1910_s13 = inlined_call_operand.vmem [shape: f32[1,32], index: 13, kind: input, shape index: {}]   ;;  %s1911_s14 = inlined_call_operand.vmem [shape: bf16[32,128], index: 14, kind: input, shape index: {}]   ;;  %s1912_s15 = inlined_call_operand.vmem [shape: f32[1,128], index: 15, kind: input, shape index: {}]   ;;  %s1913_s16 = inlined_call_operand.vmem [shape: bf16[128,32], index: 16, kind: input, shape index: {}]   ;;  %s1914_s17 = inlined_call_operand.vmem [shape: f32[1,32], index: 17, kind: input, shape index: {}]   ;;  %s1915_s18 = inlined_call_operand.hbm [shape: f32[2,8,32], index: 18, kind: output, shape index: {}]  }
   0x1   :  { %1920 = sst [smem:[#allocation10_spill]] %s1897_s0 }
   0x2   :  { %1921 = sst [smem:[#allocation11_spill]] %s1898_s1 }
   0x3   :  { %1922 = sst [smem:[#allocation12_spill]] %s1899_s2 }
   0x4   :  { %1923 = sst [smem:[#allocation13_spill]] %s1900_s3 }
   0x5   :  { %1924 = sst [smem:[#allocation14_spill]] %s1901_s4 }
   0x6   :  { %23 = vsyncpa [#allocation4], 0 }
   0x7   :  { %25 = vsyncpa [#allocation4 + $0x1], 0  ;;  %s1658_s27 = smov 0   ;;  %s1660_s28 = smov 0  }
   0x8   :  { %s1662_s29 = smov 0   ;;  %s1664_s30 = smov 0  }
   0x9 LB: > { %1925 = sst [smem:[#allocation6_spill]] %s1550_s29  ;;  %s1679_s0 = sadd.s32 4294967295, %s1554_s30   ;;  %s1554_s30 = sphi %s1664_s30, %s1937_s30   ;;  %s1550_s29 = sphi %s1662_s29, %s1939_s29   ;;  %s1546_s28 = sphi %s1660_s28, %s1941_s28   ;;  %s1542_s27 = sphi %s1658_s27, %s1940_s27  }
   0xa   : > { %s1300_s19 = sadd.s32 4294967294, %s1554_s30   ;;  %s1683_s1 = sadd.s32 1, %s1554_s30  }
   0xb   : > { %1926 = sst [smem:[#allocation7_spill]] %s1683_s1  ;;  %s421_s20 = sadd.s32 1, %s1550_s29 }
   0xc   : > { %s418_s21 = ssub.s32 %s1554_s30, %s1683_s1  ;;  %p431_p0 = scmp.ne.s32.totalorder %s1550_s29, %s1546_s28 }
   0xd   : > { %p419_p1 = scmp.eq.s32.totalorder %s418_s21, 0  ;;  %p432_p2 = scmp.eq.s32.totalorder %s1679_s0, 1 }
   0xe   : > { %p437_p3 = scmp.ne.s32.totalorder %s1546_s28, %s1542_s27  ;;  %p438_p4 = scmp.eq.s32.totalorder %s1300_s19, 1 }
   0xf   : > { %s1694_s22 = scalar_select %p419_p1, %s1550_s29, %s421_s20  }
  0x10   : > { %p1696_p5 = por %p432_p2, %p431_p0  ;;  %p1700_p6 = por %p438_p4, %p437_p3 }
  0x11   : > { %1927 = sst [smem:[#allocation8_spill]] %s1694_s22  ;;  %p1303_p7 = scmp.ge.s32.totalorder %s1554_s30, 1 }
  0x12   : > { %s1929_s23 = scalar_select %p1700_p6, 1, 0 }
  0x13   : > { %p514_p8 = scmp.lt.s32.totalorder %s1554_s30, 3 }
  0x14   : > { %1930 = sst [smem:[#allocation9_spill]] %s1929_s23 }
  0x15   : > { %p515_p9 = pnand %p1303_p7, %p514_p8 }
  0x16   : > { %p567_p10 = scmp.lt.s32.totalorder (!%p515_p9), %s1679_s0, 1  ;;  %s1931_s20 = sld [smem:[#allocation10_spill]] (!%p515_p9) }
  0x17   : > { %518 = sbr.rel (%p515_p9) target bundleno = 1907 (0x773), region = 92  ;;  %s1932_s3 = sld [smem:[#allocation13_spill]] (!%p515_p9) }
  0x18   : > { %s1933_s22 = sld [smem:[#allocation11_spill]] (!%p515_p9)  ;;  %s1557_s29 = smov (!%p515_p9), 112  }
  0x19   : > { %s1934_s19 = sld [smem:[#allocation12_spill]] (!%p515_p9)  ;;  %s1558_s1 = smov (!%p515_p9), 120  }
  0x1a   : > { %s1935_s4 = sld [smem:[#allocation14_spill]] (!%p515_p9)  ;;  %s1559_s26 = smov (!%p515_p9), 104  }
  0x1c   : > { %s568_s24 = scalar_select %p567_p10, %s1679_s0, 1  ;;  %vm573_vm0 = vcmask 261120   ;;  %v1556_v2 = vmov 32.0   ;;  %v1398_v15 = vld [vmem:[%s1902_s5 + $0x8] sm:$0xff]  ;;  %v1397_v17 = vld [vmem:[%s1902_s5] sm:$0xff]  ;;  %vm719_vm5 = vcmask 64512  }
  0x1d   : > { %1470 = vrcp.f32 %v1556_v2  ;;  %v1396_v14 = vld [vmem:[%s1932_s3 + $0x8] sm:$0xff]  ;;  %677 = vmatpush.bf16.msra.mxu2 %v1398_v15  ;;  %v1395_v16 = vld [vmem:[%s1932_s3] sm:$0xff]  ;;  %vm768_vm6 = vcmask 1043456  }
  0x1e   : > { %s1305_s25 = sshll.u32 %s568_s24, 3  ;;  %643 = vmatpush.bf16.msra.mxu0 %v1396_v14  ;;  %v1400_v18 = vld [vmem:[%s1904_s7 + $0x8] sm:$0xff]  ;;  %v1399_v21 = vld [vmem:[%s1904_s7] sm:$0xff] }
  0x1f   : > { %s570_s21 = scalar_lea.vmem %s1931_s20, %s1305_s25  ;;  %v1459_v29 = vld [vmem:[%s1933_s22] ss:$0 sm:$0xff]  ;;  %s1561_s20 = smov 16  }
  0x20   : > { %v1711_v0 = vld [vmem:[%s570_s21] sm:$0xff]  ;;  %s1562_s21 = smov 24   ;;  %s564_s22 = sand.u32 1, %s1546_s28  }
  0x21   : > { %v574_v1 = vsel %vm573_vm0, %v1711_v0, 0.0  ;;  %678 = vmatpush.bf16.msra.mxu2 %v1397_v17  ;;  %v1460_v32 = vld [vmem:[%s1934_s19] ss:$0 sm:$0xff]  ;;  %s1560_s19 = smov 8   ;;  %s1304_s23 = sshll.u32 %s564_s22, 3 }
  0x22   : > { %575 = vadd.xlane.f32.xlu0 %v574_v1  ;;  %644 = vmatpush.bf16.msra.mxu0 %v1395_v16  ;;  %v1461_v36 = vld [vmem:[%s1935_s4] ss:$0 sm:$0xff] }
  0x23   : > { %v1471_v3 = vpop.eup %1470  ;;  %v1462_v40 = vld [vmem:[%s1903_s6] ss:$0 sm:$0xff] }
  0x24   : > { %v578_v4 = vmul.f32 32.0, %v1471_v3  ;;  %vm582_vm1 = vweird.f32 %v1471_v3  ;;  %v1463_v51 = vld [vmem:[%s1905_s8] ss:$0 sm:$0xff] }
  0x25   : > { %711 = vmatpush.bf16.msrb.mxu2 %v1400_v18 }
  0x26   : > { %v579_v5 = vsub.f32 1.0, %v578_v4 }
  0x28   : > { %v580_v6 = vmul.f32 %v1471_v3, %v579_v5 }
  0x29   : > { %712 = vmatpush.bf16.msrb.mxu2 %v1399_v21 }
  0x2a   : > { %v581_v7 = vadd.f32 %v1471_v3, %v580_v6 }
  0x2c   : > { %v1715_v8 = vsel %vm582_vm1, %v1471_v3, %v581_v7 }
  0x95   : > { %v576_v9 = vpop.xlane.xlu0 %575 }
  0x96   : > { %v584_v10 = vmul.f32 %v1715_v8, %v576_v9 }
  0x98   : > { %v585_v11 = vsub.f32 %v1711_v0, %v584_v10 }
  0x9a   : > { %v586_v12 = vmul.f32 %v585_v11, %v585_v11 }
  0x9c   : > { %v587_v13 = vsel %vm573_vm0, %v586_v12, 0.0 }
  0x9d   : > { %588 = vadd.xlane.f32.xlu0 %v587_v13 }
 0x110   : > { %v589_v19 = vpop.xlane.xlu0 %588 }
 0x111   : > { %v590_v20 = vmul.f32 %v589_v19, %v1715_v8 }
 0x113   : > { %v591_v22 = vadd.f32 1e-05, %v590_v20 }
 0x115   : > { %1472 = vrsqrt.f32 %v591_v22  ;;  %vm598_vm3 = vweird.f32 %v591_v22 }
 0x11b   : > { %v1473_v23 = vpop.eup %1472 }
 0x11c   : > { %v593_v24 = vmul.f32 %v1473_v23, %v591_v22  ;;  %vm599_vm2 = vweird.f32 %v1473_v23 }
 0x11d   : > { %vm600_vm4 = vmor %vm598_vm3, %vm599_vm2 }
 0x11e   : > { %v594_v25 = vmul.f32 %v1473_v23, %v593_v24 }
 0x120   : > { %v595_v26 = vmul.f32 0.5, %v594_v25 }
 0x122   : > { %v596_v27 = vsub.f32 1.5, %v595_v26 }
 0x124   : > { %v597_v28 = vmul.f32 %v1473_v23, %v596_v27 }
 0x126   : > { %v601_v30 = vsel %vm600_vm4, %v1473_v23, %v597_v28 }
 0x127   : > { %v602_v31 = vmul.f32 %v601_v30, %v585_v11 }
 0x129   : > { %v607_v33 = vmul.f32 %v1459_v29, %v602_v31 }
 0x12b   : > { %v612_v34 = vadd.f32 %v1460_v32, %v607_v33 }
 0x12d   : > { %v613_v35 = vpack.c.bf16 %v612_v34, %v612_v34 }
 0x12f   : > { %1314 = vmatmul.msk.bf16.vlgmr.msra.gmra.mxu0 %vm573_vm0, %v613_v35  ;;  %1323 = vmatmul.msk.bf16.vlgmr.msra.gmra.mxu2 %vm573_vm0, %v613_v35 }
 0x13f   : > { %1332 = vmatmul.msk.bf16.vlgmr.msrb.gmra.mxu2 %vm573_vm0, %v613_v35 }
 0x1ac   : > { %v646_v37 = vpop.f32.mrf.mxu0 }
 0x1ad   : > { %v647_v38 = vadd.f32 %v1461_v36, %v646_v37 }
 0x1af   : > { %v650_v39 = vpack.c.bf16 %v647_v38, %v647_v38 }
 0x1b1   : > { %v789_v41 = vunpack.c.l.b16 %v650_v39 }
 0x1b2   : > { %v680_v42 = vpop.f32.mrf.mxu2 }
 0x1b3   : > { %v790_v43 = vpack.c.b16 %v789_v41, %v789_v41  ;;  %v681_v44 = vadd.f32 %v1462_v40, %v680_v42 }
 0x1b4   : > { %v648_v45 = vpop.f32.mrf.mxu0 }
 0x1b5   : > { %v684_v46 = vpack.c.bf16 %v681_v44, %v681_v44  ;;  %874 = vrot.lane.b32.xlu0 %v790_v43, %s1557_s29 }
 0x1b7   : > { %v794_v47 = vunpack.c.l.b16 %v684_v46  ;;  %v724_v48 = vsel %vm719_vm5, %v684_v46, 0 }
 0x1b8   : > { %733 = vmatpush.bf16.xpose.msra.mxu3 %v724_v48 }
 0x1b9   : > { %v795_v49 = vpack.c.b16 %v794_v47, %v794_v47 }
 0x1ba   : > { %v682_v50 = vpop.f32.mrf.mxu2 }
 0x1bb   : > { %876 = vrot.lane.b32.xlu2 %v795_v49, %s1557_s29  ;;  %796 = vrot.lane.b32.xlu1 %v795_v49, %s1558_s1 }
 0x1bf   : > { %1333 = vmatmul.msk.bf16.vlgmr.msra.gmra.mxu3 %vm719_vm5, %v650_v39 }
 0x1c2   : > { %v714_v52 = vpop.f32.mrf.mxu2 }
 0x1c3   : > { %v715_v53 = vadd.f32 %v1463_v51, %v714_v52  ;;  %953 = vrot.lane.b32.xlu2 %v795_v49, %s1559_s26  ;;  %791 = vrot.lane.b32.xlu1 %v790_v43, %s1558_s1 }
 0x1c5   : > { %v718_v54 = vpack.c.bf16 %v715_v53, %v715_v53 }
 0x1c7   : > { %v770_v55 = vsel %vm768_vm6, %v718_v54, 0  ;;  %v844_v25 = vunpack.c.l.b16 %v718_v54 }
 0x1c8   : > { %779 = vmatpush.bf16.msrb.mxu0 %v770_v55 }
 0x1c9   : > { %v845_v26 = vpack.c.b16 %v844_v25, %v844_v25 }
 0x1ca   : > { %v716_v56 = vpop.f32.mrf.mxu2 }
 0x1cb   : > { %951 = vrot.lane.b32.xlu1 %v790_v43, %s1559_s26 }
 0x215   : > { %v877_v57 = vpop.permute.xlu2 %876 }
 0x216   : > { %v882_v58 = vsel %vm719_vm5, %v877_v57, 0 }
 0x217   : > { %891 = vmatpush.bf16.xpose.msrb.mxu3 %v882_v58 }
 0x21d   : > { %v954_v60 = vpop.permute.xlu2 %953 }
 0x21e   : > { %v959_v63 = vsel %vm719_vm5, %v954_v60, 0 }
 0x227   : > { %v875_v59 = vpop.permute.xlu0 %874 }
 0x228   : > { %1337 = vmatmul.msk.bf16.vlgmr.msrb.gmra.mxu3 %vm719_vm5, %v875_v59 }
 0x22d   : > { %v797_v61 = vpop.permute.xlu1 %796 }
 0x22e   : > { %v802_v62 = vsel %vm719_vm5, %v797_v61, 0 }
 0x22f   : > { %811 = vmatpush.bf16.xpose.msra.mxu1 %v802_v62 }
 0x235   : > { %v792_v1 = vpop.permute.xlu1 %791 }
 0x236   : > { %1335 = vmatmul.msk.bf16.vlgmr.msra.gmra.mxu1 %vm719_vm5, %v792_v1 }
 0x237   : > { %968 = vmatpush.bf16.xpose.msrb.mxu1 %v959_v63 }
 0x23d   : > { %v952_v4 = vpop.permute.xlu1 %951 }
 0x242   : > { %v735_v2 = vpop.f32.mrf.mxu3 }
 0x243   : > { %v739_v3 = vmul.f32 0.35355338, %v735_v2 }
 0x245   : > { %v740_v5 = vsel %vm719_vm5, %v739_v3, -inf }
 0x246   : > { %1339 = vmatmul.msk.bf16.vlgmr.msrb.gmra.mxu1 %vm719_vm5, %v952_v4  ;;  %741 = vmax.xlane.f32.xlu1 %v740_v5 }
 0x24a   : > { %v737_v6 = vpop.f32.mrf.mxu3 }
 0x2ab   : > { %v893_v7 = vpop.f32.mrf.mxu3 }
 0x2ac   : > { %v897_v14 = vmul.f32 0.35355338, %v893_v7 }
 0x2ae   : > { %v898_v18 = vsel %vm719_vm5, %v897_v14, -inf }
 0x2b3   : > { %v813_v9 = vpop.f32.mrf.mxu1  ;;  %v895_v10 = vpop.f32.mrf.mxu3 }
 0x2b4   : > { %v817_v11 = vmul.f32 0.35355338, %v813_v9 }
 0x2b6   : > { %v818_v12 = vsel %vm719_vm5, %v817_v11, -inf }
 0x2b7   : > { %819 = vmax.xlane.f32.xlu2 %v818_v12 }
 0x2b9   : > { %v742_v13 = vpop.xlane.xlu1 %741 }
 0x2ba   : > { %v743_v15 = vsub.f32 %v739_v3, %v742_v13 }
 0x2bb   : > { %v815_v16 = vpop.f32.mrf.mxu1 }
 0x2bc   : > { %v744_v17 = vmul.f32 1.442695, %v743_v15 }
 0x2be   : > { %1474 = vpow2.f32 %v744_v17 }
 0x2bf   : > { %899 = vmax.xlane.f32.xlu2 %v898_v18 }
 0x2c3   : > { %v970_v19 = vpop.f32.mrf.mxu1 }
 0x2c4   : > { %v1475_v20 = vpop.eup %1474  ;;  %v974_v21 = vmul.f32 0.35355338, %v970_v19 }
 0x2c5   : > { %v746_v22 = vsel %vm719_vm5, %v1475_v20, 0.0 }
 0x2c6   : > { %747 = vadd.xlane.f32.xlu1 %v746_v22  ;;  %v975_v23 = vsel %vm719_vm5, %v974_v21, -inf }
 0x2c7   : > { %976 = vmax.xlane.f32.xlu0 %v975_v23 }
 0x2cb   : > { %v972_v24 = vpop.f32.mrf.mxu1 }
 0x2df   : > { %846 = vrot.lane.b32.xlu1 %v845_v26, %s1558_s1 }
 0x32a   : > { %v820_v27 = vpop.xlane.xlu2 %819 }
 0x32b   : > { %v821_v28 = vsub.f32 %v817_v11, %v820_v27 }
 0x32d   : > { %v822_v29 = vmul.f32 1.442695, %v821_v28 }
 0x32f   : > { %1476 = vpow2.f32 %v822_v29 }
 0x332   : > { %v900_v30 = vpop.xlane.xlu2 %899 }
 0x333   : > { %v901_v31 = vsub.f32 %v897_v14, %v900_v30 }
 0x335   : > { %v1477_v32 = vpop.eup %1476  ;;  %v902_v33 = vmul.f32 1.442695, %v901_v31 }
 0x336   : > { %v824_v34 = vsel %vm719_vm5, %v1477_v32, 0.0 }
 0x337   : > { %1478 = vpow2.f32 %v902_v33  ;;  %825 = vadd.xlane.f32.xlu2 %v824_v34 }
 0x339   : > { %v748_v35 = vpop.xlane.xlu1 %747 }
 0x33a   : > { %1480 = vrcp.f32 %v748_v35  ;;  %v977_v36 = vpop.xlane.xlu0 %976  ;;  %v760_v44 = vand.u32 2147483648, %v748_v35  ;;  %v758_v47 = vand.u32 2147483647, %v748_v35  ;;  %vm754_vm8 = vweird.f32 %v748_v35 }
 0x33b   : > { %v978_v37 = vsub.f32 %v974_v21, %v977_v36 }
 0x33c   : > { %v761_v50 = vor.u32 1.1754944e-38, %v760_v44  ;;  %vm759_vm10 = vcmp.eq.f32.partialorder %v758_v47, 8.507059e+37 }
 0x33d   : > { %v1779_v38 = vpop.eup %1478  ;;  %v979_v39 = vmul.f32 1.442695, %v978_v37 }
 0x33e   : > { %v904_v40 = vsel %vm719_vm5, %v1779_v38, 0.0 }
 0x33f   : > { %1482 = vpow2.f32 %v979_v39  ;;  %905 = vadd.xlane.f32.xlu0 %v904_v40 }
 0x340   : > { %v1481_v41 = vpop.eup %1480 }
 0x341   : > { %v750_v42 = vmul.f32 %v1481_v41, %v748_v35  ;;  %vm755_vm7 = vweird.f32 %v1481_v41 }
 0x342   : > { %vm756_vm9 = vmor %vm754_vm8, %vm755_vm7 }
 0x343   : > { %v751_v43 = vsub.f32 1.0, %v750_v42 }
 0x345   : > { %v1783_v45 = vpop.eup %1482  ;;  %v752_v46 = vmul.f32 %v1481_v41, %v751_v43 }
 0x346   : > { %v981_v48 = vsel %vm719_vm5, %v1783_v45, 0.0 }
 0x347   : > { %v753_v49 = vadd.f32 %v1481_v41, %v752_v46  ;;  %982 = vadd.xlane.f32.xlu2 %v981_v48 }
 0x349   : > { %v757_v51 = vsel %vm756_vm9, %v1481_v41, %v753_v49 }
 0x34a   : > { %v762_v52 = vsel %vm759_vm10, %v761_v50, %v757_v51  ;;  %vm786_vm10 = vcmask 60416   ;;  %v1402_v50 = vld [vmem:[%s1906_s9 + $0x8] sm:$0xff]  ;;  %v1401_v51 = vld [vmem:[%s1906_s9] sm:$0xff] }
 0x34b   : > { %v763_v53 = vmul.f32 %v1475_v20, %v762_v52  ;;  %1058 = vmatpush.bf16.msra.mxu3 %v1402_v50 }
 0x34d   : > { %v764_v54 = vpack.c.bf16 %v763_v53, %v763_v53 }
 0x34f   : > { %1334 = vmatmul.msk.bf16.vlgmr.msrb.gmra.mxu0 %vm719_vm5, %v764_v54  ;;  %1059 = vmatpush.bf16.msra.mxu3 %v1401_v51 }
 0x351   : > { %v847_v55 = vpop.permute.xlu1 %846 }
 0x352   : > { %v852_v56 = vsel %vm768_vm6, %v847_v55, 0 }
 0x353   : > { %861 = vmatpush.bf16.msra.mxu2 %v852_v56  ;;  %923 = vrot.lane.b32.xlu0 %v845_v26, %s1557_s29  ;;  %v1464_v56 = vld [vmem:[%s1907_s10] ss:$0 sm:$0xff]  ;;  %s566_s29 = scalar_lea.vmem [#allocation3], %s1304_s23  ;;  %s1512_s23 = scalar_lea.hbm %s1915_s18, 16 }
 0x354   : > { %s1238_s1 = sshll.u32 %s566_s29, 4  ;;  %s1239_s1 = int_to_ptr.vmem [resolvable:$true] %s1238_s1 }
 0x35f   : > { %1000 = vrot.lane.b32.xlu2 %v845_v26, %s1559_s26  ;;  %s1392_s26 = sshll.u32 %s1679_s0, 3  ;;  %s1226_s0 = scalar_lea.sflag [#allocation4], %s564_s22 }
 0x360   : > { %s1236_s25 = scalar_lea.hbm %s1915_s18, %s1392_s26 }
 0x361   : > { %s1240_s3 = sshll.u32 %s1236_s25, 4  ;;  %s1241_s3 = int_to_ptr.hbm [resolvable:$true] %s1240_s3 }
 0x362   : > { %s1506_s4 = sshra.s32 %s1241_s3, 4  ;;  %s1507_s4 = int_to_ptr.hbm [resolvable:$true] %s1506_s4 }
 0x363   : > { %p1513_p0 = scmp.lt.s32.totalorder %s1507_s4, %s1915_s18 }
 0x3aa   : > { %v826_v57 = vpop.xlane.xlu2 %825 }
 0x3ab   : > { %1484 = vrcp.f32 %v826_v57  ;;  %v838_v62 = vand.u32 2147483648, %v826_v57  ;;  %v836_v1 = vand.u32 2147483647, %v826_v57  ;;  %vm832_vm12 = vweird.f32 %v826_v57 }
 0x3ad   : > { %v839_v4 = vor.u32 1.1754944e-38, %v838_v62  ;;  %vm837_vm14 = vcmp.eq.f32.partialorder %v836_v1, 8.507059e+37 }
 0x3b1   : > { %v1485_v58 = vpop.eup %1484 }
 0x3b2   : > { %v828_v59 = vmul.f32 %v1485_v58, %v826_v57  ;;  %v906_v60 = vpop.xlane.xlu0 %905  ;;  %vm833_vm11 = vweird.f32 %v1485_v58  ;;  %v1465_v57 = vld [vmem:[%s1908_s11] ss:$0 sm:$0xff] }
 0x3b3   : > { %1486 = vrcp.f32 %v906_v60  ;;  %vm834_vm13 = vmor %vm832_vm12, %vm833_vm11  ;;  %v918_v12 = vand.u32 2147483648, %v906_v60  ;;  %v916_v14 = vand.u32 2147483647, %v906_v60  ;;  %vm912_vm1 = vweird.f32 %v906_v60 }
 0x3b4   : > { %v829_v61 = vsub.f32 1.0, %v828_v59  ;;  %vm1026_vm11 = vcmask 257216  }
 0x3b5   : > { %v919_v18 = vor.u32 1.1754944e-38, %v918_v12  ;;  %vm917_vm3 = vcmp.eq.f32.partialorder %v916_v14, 8.507059e+37  ;;  %v1409_v14 = vld [vmem:[%s1913_s16 + $0x20] sm:$0xff] }
 0x3b6   : > { %v830_v63 = vmul.f32 %v1485_v58, %v829_v61 }
 0x3b8   : > { %v831_v2 = vadd.f32 %v1485_v58, %v830_v63 }
 0x3b9   : > { %v1487_v3 = vpop.eup %1486 }
 0x3ba   : > { %v835_v5 = vsel %vm834_vm13, %v1485_v58, %v831_v2  ;;  %v908_v6 = vmul.f32 %v1487_v3, %v906_v60  ;;  %v983_v7 = vpop.xlane.xlu2 %982  ;;  %vm913_vm15 = vweird.f32 %v1487_v3 }
 0x3bb   : > { %v840_v9 = vsel %vm837_vm14, %v839_v4, %v835_v5  ;;  %1488 = vrcp.f32 %v983_v7  ;;  %vm914_vm2 = vmor %vm912_vm1, %vm913_vm15  ;;  %v995_v26 = vand.u32 2147483648, %v983_v7  ;;  %v993_v29 = vand.u32 2147483647, %v983_v7 }
 0x3bc   : > { %v841_v10 = vmul.f32 %v1477_v32, %v840_v9  ;;  %v909_v11 = vsub.f32 1.0, %v908_v6  ;;  %vm989_vm7 = vweird.f32 %v983_v7  ;;  %v1404_v6 = vld [vmem:[%s1911_s14 + $0x8] sm:$0xff] }
 0x3bd   : > { %v996_v33 = vor.u32 1.1754944e-38, %v995_v26  ;;  %vm994_vm9 = vcmp.eq.f32.partialorder %v993_v29, 8.507059e+37  ;;  %v1406_v29 = vld [vmem:[%s1913_s16 + $0x8] sm:$0xff] }
 0x3be   : > { %v910_v13 = vmul.f32 %v1487_v3, %v909_v11  ;;  %v842_v15 = vpack.c.bf16 %v841_v10, %v841_v10  ;;  %v1411_v11 = vld [vmem:[%s1913_s16 + $0x30] sm:$0xff] }
 0x3c0   : > { %v911_v16 = vadd.f32 %v1487_v3, %v910_v13  ;;  %1336 = vmatmul.msk.bf16.vlgmr.msra.gmra.mxu2 %vm719_vm5, %v842_v15  ;;  %v1410_v13 = vld [vmem:[%s1913_s16 + $0x28] sm:$0xff] }
 0x3c1   : > { %v1489_v17 = vpop.eup %1488 }
 0x3c2   : > { %v915_v19 = vsel %vm914_vm2, %v1487_v3, %v911_v16  ;;  %v985_v20 = vmul.f32 %v1489_v17, %v983_v7  ;;  %v1001_v21 = vpop.permute.xlu2 %1000  ;;  %vm990_vm4 = vweird.f32 %v1489_v17  ;;  %v1412_v7 = vld [vmem:[%s1913_s16 + $0x38] sm:$0xff] }
 0x3c3   : > { %v920_v22 = vsel %vm917_vm3, %v919_v18, %v915_v19  ;;  %v1006_v23 = vsel %vm768_vm6, %v1001_v21, 0  ;;  %vm991_vm8 = vmor %vm989_vm7, %vm990_vm4  ;;  %1210 = vmatpush.bf16.msra.mxu1 %v1412_v7  ;;  %v1407_v19 = vld [vmem:[%s1913_s16 + $0x10] sm:$0xff] }
 0x3c4   : > { %v921_v24 = vmul.f32 %v1779_v38, %v920_v22  ;;  %v986_v25 = vsub.f32 1.0, %v985_v20  ;;  %1015 = vmatpush.bf16.msrb.mxu2 %v1006_v23  ;;  %v1466_v22 = vld [vmem:[%s1909_s12] ss:$0 sm:$0xff] }
 0x3c5   : > { %v924_v27 = vpop.permute.xlu0 %923 }
 0x3c6   : > { %v987_v28 = vmul.f32 %v1489_v17, %v986_v25  ;;  %v929_v30 = vsel %vm768_vm6, %v924_v27, 0  ;;  %v922_v32 = vpack.c.bf16 %v921_v24, %v921_v24  ;;  %vm949_vm6 = vcmask 191616   ;;  %v1467_v25 = vld [vmem:[%s1910_s13] ss:$0 sm:$0xff] }
 0x3c7   : > { %938 = vmatpush.bf16.msra.mxu0 %v929_v30  ;;  %1211 = vmatpush.bf16.msra.mxu1 %v1411_v11  ;;  %v1405_v30 = vld [vmem:[%s1913_s16] sm:$0xff] }
 0x3c8   : > { %v988_v31 = vadd.f32 %v1489_v17, %v987_v28 }
 0x3ca   : > { %v992_v34 = vsel %vm991_vm8, %v1489_v17, %v988_v31  ;;  %1338 = vmatmul.msk.bf16.vlgmr.msra.gmra.mxu0 %vm719_vm5, %v922_v32  ;;  %v1468_v31 = vld [vmem:[%s1912_s15] ss:$0 sm:$0xff] }
 0x3cb   : > { %v997_v35 = vsel %vm994_vm9, %v996_v33, %v992_v34  ;;  %1133 = vmatpush.bf16.msrb.mxu0 %v1404_v6  ;;  %1212 = vmatpush.bf16.msra.mxu1 %v1410_v13 }
 0x3cc   : > { %v998_v36 = vmul.f32 %v1783_v45, %v997_v35  ;;  %v781_v37 = vpop.f32.mrf.mxu0 }
 0x3cd   : > { %v785_v38 = vpack.c.bf16 %v781_v37, %v781_v37  ;;  %v1469_v37 = vld [vmem:[%s1914_s17] ss:$0 sm:$0xff] }
 0x3ce   : > { %v999_v39 = vpack.c.bf16 %v998_v36, %v998_v36 }
 0x3cf   : > { %787 = vst.msk [vmem:[#allocation2] sm:$0xf] %vm786_vm10, %v785_v38  ;;  %1213 = vmatpush.bf16.msra.mxu1 %v1409_v14 }
 0x3d0   : > { %1340 = vmatmul.msk.bf16.vlgmr.msrb.gmra.mxu2 %vm719_vm5, %v999_v39  ;;  %vm872_vm5 = vcmask 126016  }
 0x3d4   : > { %v783_v40 = vpop.f32.mrf.mxu0 }
 0x443   : > { %v863_v41 = vpop.f32.mrf.mxu2 }
 0x444   : > { %v867_v42 = vpack.c.bf16 %v863_v41, %v863_v41 }
 0x446   : > { %869 = vrot.lane.b32.xlu1 %v867_v42, %s1560_s19  ;;  %s1508_s19 = scalar_lea.hbm %s1507_s4, 8 }
 0x447   : > { %v940_v43 = vpop.f32.mrf.mxu0  ;;  %p1509_p11 = scmp.ne.s32.totalorder %s1507_s4, %s1508_s19  ;;  %p1514_p1 = scmp.lt.s32.totalorder %s1512_s23, %s1508_s19 }
 0x448   : > { %v944_v44 = vpack.c.bf16 %v940_v43, %v940_v43 }
 0x449   : > { %p1510_p12 = pnand %p1509_p11, %p1696_p5  ;;  %p1515_p2 = por %p1514_p1, %p1513_p0 }
 0x44a   : > { %946 = vrot.lane.b32.xlu2 %v944_v44, %s1561_s20 }
 0x44b   : > { %v865_v46 = vpop.f32.mrf.mxu2  ;;  %p1511_p13 = pneg %p1510_p12 }
 0x44d   : > { %p1516_p3 = pnand %p1515_p2, %p1511_p13 }
 0x44f   : > { %v942_v47 = vpop.f32.mrf.mxu0 }
 0x453   : > { %v1017_v48 = vpop.f32.mrf.mxu2 }
 0x454   : > { %v1021_v45 = vpack.c.bf16 %v1017_v48, %v1017_v48 }
 0x456   : > { %1023 = vrot.lane.b32.xlu0 %v1021_v45, %s1562_s21 }
 0x45b   : > { %v1019_v49 = vpop.f32.mrf.mxu2 }
 0x4a4   : > { %v947_v53 = vpop.permute.xlu2 %946 }
 0x4b8   : > { %v870_v52 = vpop.permute.xlu1 %869 }
 0x4b9   : > { %873 = vst.msk [vmem:[#allocation2] sm:$0xf] %vm872_vm5, %v870_v52 }
 0x4ba   : > { %950 = vst.msk [vmem:[#allocation2] sm:$0xf] %vm949_vm6, %v947_v53 }
 0x4c8   : > { %v1024_v54 = vpop.permute.xlu0 %1023 }
 0x4c9   : > { %1027 = vst.msk [vmem:[#allocation2] sm:$0xf] %vm1026_vm11, %v1024_v54 }
 0x4d0   : > { %v1028_v55 = vld [vmem:[#allocation2] sm:$0xf] }
 0x4d1   : > { %1349 = vmatmul.msk.bf16.vlgmr.msra.gmra.mxu3 %vm573_vm0, %v1028_v55 }
 0x554   : > { %v1061_v58 = vpop.f32.mrf.mxu3 }
 0x555   : > { %v1062_v59 = vadd.f32 %v1464_v56, %v1061_v58 }
 0x557   : > { %v1069_v60 = vmul.f32 %v1465_v57, %v1062_v59 }
 0x559   : > { %v1812_v61 = vadd.f32 %v1069_v60, %v1711_v0  ;;  %v1403_v0 = vld [vmem:[%s1911_s14] sm:$0xff] }
 0x55a   : > { %1134 = vmatpush.bf16.msrb.mxu0 %v1403_v0 }
 0x55b   : > { %v1071_v62 = vsel %vm573_vm0, %v1812_v61, 0.0 }
 0x55c   : > { %v1063_v63 = vpop.f32.mrf.mxu3  ;;  %1072 = vadd.xlane.f32.xlu1 %v1071_v62 }
 0x5cf   : > { %v1073_v1 = vpop.xlane.xlu1 %1072 }
 0x5d0   : > { %v1074_v2 = vmul.f32 %v1073_v1, %v1715_v8 }
 0x5d2   : > { %v1075_v3 = vsub.f32 %v1812_v61, %v1074_v2 }
 0x5d4   : > { %v1076_v4 = vmul.f32 %v1075_v3, %v1075_v3 }
 0x5d6   : > { %v1077_v5 = vsel %vm573_vm0, %v1076_v4, 0.0 }
 0x5d7   : > { %1078 = vadd.xlane.f32.xlu2 %v1077_v5 }
 0x64a   : > { %v1079_v9 = vpop.xlane.xlu2 %1078 }
 0x64b   : > { %v1080_v10 = vmul.f32 %v1079_v9, %v1715_v8  ;;  %v1408_v8 = vld [vmem:[%s1913_s16 + $0x18] sm:$0xff] }
 0x64c   : > { %1214 = vmatpush.bf16.msra.mxu1 %v1408_v8 }
 0x64d   : > { %v1081_v12 = vadd.f32 1e-05, %v1080_v10 }
 0x64f   : > { %1490 = vrsqrt.f32 %v1081_v12  ;;  %vm1088_vm13 = vweird.f32 %v1081_v12 }
 0x650   : > { %1215 = vmatpush.bf16.msra.mxu1 %v1407_v19 }
 0x654   : > { %1216 = vmatpush.bf16.msra.mxu1 %v1406_v29 }
 0x655   : > { %v1491_v15 = vpop.eup %1490 }
 0x656   : > { %v1083_v16 = vmul.f32 %v1491_v15, %v1081_v12  ;;  %vm1089_vm12 = vweird.f32 %v1491_v15 }
 0x657   : > { %vm1090_vm14 = vmor %vm1088_vm13, %vm1089_vm12 }
 0x658   : > { %v1084_v17 = vmul.f32 %v1491_v15, %v1083_v16  ;;  %1217 = vmatpush.bf16.msra.mxu1 %v1405_v30 }
 0x65a   : > { %v1085_v18 = vmul.f32 0.5, %v1084_v17 }
 0x65c   : > { %v1086_v20 = vsub.f32 1.5, %v1085_v18 }
 0x65e   : > { %v1087_v21 = vmul.f32 %v1491_v15, %v1086_v20 }
 0x660   : > { %v1091_v23 = vsel %vm1090_vm14, %v1491_v15, %v1087_v21 }
 0x661   : > { %v1092_v24 = vmul.f32 %v1091_v23, %v1075_v3 }
 0x663   : > { %v1097_v26 = vmul.f32 %v1466_v22, %v1092_v24 }
 0x665   : > { %v1102_v27 = vadd.f32 %v1467_v25, %v1097_v26 }
 0x667   : > { %v1103_v28 = vpack.c.bf16 %v1102_v27, %v1102_v27 }
 0x669   : > { %1358 = vmatmul.msk.bf16.vlgmr.msrb.gmra.mxu0 %vm573_vm0, %v1103_v28 }
 0x6e6   : > { %v1136_v32 = vpop.f32.mrf.mxu0 }
 0x6e7   : > { %v1137_v33 = vadd.f32 %v1468_v31, %v1136_v32 }
 0x6e9   : > { %v1140_v34 = vmax.f32 %v1137_v33, 0.0 }
 0x6eb   : > { %v1141_v35 = vpack.c.bf16 %v1140_v34, %v1140_v34 }
 0x6ed   : > { %1218 = vmatmul.bf16.vlgmr.msra.gmra.mxu1 %v1141_v35 }
 0x6ee   : > { %v1138_v36 = vpop.f32.mrf.mxu0 }
 0x76a   : > { %v1219_v38 = vpop.f32.mrf.mxu1 }
 0x76b   : > { %v1220_v39 = vadd.f32 %v1469_v37, %v1219_v38 }
 0x76d   : > { %v1223_v40 = vadd.f32 %v1220_v39, %v1812_v61 }
 0x76f   : > { %1224 = vst.msk [vmem:[%s566_s29] sm:$0xff] %vm573_vm0, %v1223_v40 }
 0x770   : > { %1519 = shalt.err (!%p1516_p3)
}
 0x771   : > { %1413 = dma.vmem_to_hbm [thread:$0]  (%p1696_p5), %s1239_s1, 128, %s1241_s3, %s1226_s0  }
 0x772   : > { %v1221_v41 = vpop.f32.mrf.mxu1 }
 0x773 PF: > { %p1419_p4 = scmp.ge.s32.totalorder %s1554_s30, 2  ;;  %s1252_s25 = sand.u32 1, %s1542_s27  }
 0x774   : > { %s1253_s29 = scalar_lea.sflag [#allocation4], %s1252_s25 }
 0x775   : > { %p1416_p7 = pnand %p1419_p4, %p1700_p6 }
 0x777   : > { %p1417_p8 = pneg %p1416_p7 }
 0x779   : > { %1537 = dma.done.wait (%p1417_p8), %s1253_s29, 128  }
 0x77a   : > { %1539 = vsyncadd (%p1417_p8), %s1253_s29, 4294967168  ;;  %s1937_s30 = sld [smem:[#allocation7_spill]]  ;;  %s1940_s27 = smov %s1546_s28 }
 0x77b   : > { %s1938_s4 = sld [smem:[#allocation6_spill]] }
 0x77c   : > { %s1939_s29 = sld [smem:[#allocation8_spill]] }
 0x780   : > { %p28_p9 = scmp.ge.s32.totalorder %s1937_s30, 4  }
 0x781   : > { %s1941_s28 = smov %s1938_s4 }
 0x782   :  { %30 = sbr.rel (!%p28_p9) target bundleno = 9 (0x9), region = 127 }
 0x787   :  { %1259 = vsyncpa [#allocation4], 1 }
 0x788   :  { %1261 = vsyncpa [#allocation4 + $0x1], 1 }

</bundles_post_ra>
